<compile_context>
chip_gen: v6e
topology: v6e:2x2x1
jax: 0.10.0
libtpu: 0.0.40
codegen_flags: <defaults>
</compile_context>

<pallas_src>
import math
import functools

import numpy as np
import jax
import jax.numpy as jnp
from jax import lax
from jax.experimental import pallas as pl
from jax.experimental.pallas import tpu as pltpu


# Below these sizes a pallas_call's dispatch + per-grid-step overhead exceeds the
# matmul cost -> fall back to plain XLA.  (Kept small so the toy shapes in __main__
# still exercise the Pallas kernels; ~2048 rows is a better production threshold.)
_MIN_ROWS_FOR_PALLAS_FILTER = 16
_MIN_WORK_FOR_PALLAS_ATTN = 1024          # G * E * m_q * m_kv


# ----------------------------------------------------------------------------
# tiling / VMEM budgeting helpers
# ----------------------------------------------------------------------------
def _round_up(x, m):
    return ((x + m - 1) // m) * m


@functools.lru_cache(maxsize=1)
def _vmem_budget_bytes():
    """~75% of the physical per-core VMEM (48 MiB on v7x, 96 MiB on v5e/v6e)."""
    try:
        cap = int(pltpu.get_tpu_info().vmem_capacity_bytes)
        return max(32 << 20, (cap * 3) // 4)
    except Exception:
        return 48 << 20


def _vmem_limit(block_bytes):
    return int(min(_vmem_budget_bytes(),
                   max(16 << 20, 4 * block_bytes + (2 << 20))))


def _mosaic_params(block_bytes, semantics=("parallel",)):
    return pltpu.CompilerParams(dimension_semantics=semantics,
                                vmem_limit_bytes=_vmem_limit(block_bytes))


def _row_tile(m, bytes_per_row, *, min_tile=256, target_tiles=8, cap=2048,
              block_budget=8 << 20):
    """Row tile (sublane axis): multiple of 8 (or == m when m is small), sized so
    that (a) there are >= target_tiles grid steps when m allows (>=4 per TensorCore
    on v7x keeps DMA double-buffered) and (b) the per-step block stays a few MiB."""
    cap = min(cap, max(8, (block_budget // max(bytes_per_row, 1)) // 8 * 8))
    small = min(min_tile, cap)
    if m <= small:
        return m                          # single full-extent block (tiny problem)
    tm = max(small, _round_up(-(-m // target_tiles), 8))
    return min(tm, cap)


def _group_tile(g, per_group_bytes, *, block_budget=4 << 20, min_steps=4):
    """(b,h)-groups per Fourier-attention program: as many as a few MiB of VMEM
    allows; only split into >= min_steps grid steps when the problem is big."""
    cap = max(1, block_budget // max(per_group_bytes, 1))
    if g <= cap:
        return g
    return max(1, min(cap, -(-g // min_steps)))


# ----------------------------------------------------------------------------
# Pallas kernels
# ----------------------------------------------------------------------------
def _linear_kernel(x_ref, w_ref, b_ref, o_ref):
    o_ref[...] = (jnp.dot(x_ref[...], w_ref[...],
                          preferred_element_type=jnp.float32) + b_ref[...])


def linear_pallas(x2d, w_t, b):
    """y = x2d @ w_t + b;  x2d:(M,K), w_t:(K,N), b:(N,) -> (M,N) f32."""
    M, K = x2d.shape
    N = w_t.shape[1]
    bpr = K * x2d.dtype.itemsize + N * 4
    tm = _row_tile(M, bpr)
    block_bytes = (tm * K * x2d.dtype.itemsize + K * N * w_t.dtype.itemsize
                   + N * 4 + tm * N * 4)
    return pl.pallas_call(
        _linear_kernel,
        out_shape=jax.ShapeDtypeStruct((M, N), jnp.float32),
        grid=(pl.cdiv(M, tm),),
        in_specs=[pl.BlockSpec((tm, K), lambda i: (i, 0)),
                  pl.BlockSpec((K, N), lambda i: (0, 0)),
                  pl.BlockSpec((1, N), lambda i: (0, 0))],
        out_specs=pl.BlockSpec((tm, N), lambda i: (i, 0)),
        compiler_params=_mosaic_params(block_bytes),
    )(x2d, w_t, b.reshape(1, N))


def _matmul_kernel(x_ref, w_ref, o_ref):
    o_ref[...] = jnp.dot(x_ref[...], w_ref[...], preferred_element_type=jnp.float32)


def filter_matmul(x2d, w):
    """x2d:(M,K) @ w:(K,N) -> (M,N) f32; K=N=c*2k (lane-dense block-diagonal filter)."""
    M, K = x2d.shape
    N = w.shape[1]
    if M < _MIN_ROWS_FOR_PALLAS_FILTER:
        # Tail levels of the decomposition: dispatch overhead > matmul cost.
        return jnp.dot(x2d, w, preferred_element_type=jnp.float32)
    bpr = (K + N) * 4
    tm = _row_tile(M, bpr)
    block_bytes = tm * K * 4 + K * N * 4 + tm * N * 4
    return pl.pallas_call(
        _matmul_kernel,
        out_shape=jax.ShapeDtypeStruct((M, N), jnp.float32),
        grid=(pl.cdiv(M, tm),),
        in_specs=[pl.BlockSpec((tm, K), lambda i: (i, 0)),
                  pl.BlockSpec((K, N), lambda i: (0, 0))],
        out_specs=pl.BlockSpec((tm, N), lambda i: (i, 0)),
        compiler_params=_mosaic_params(block_bytes),
    )(x2d, w)


def _fourier_attn_kernel(qr_ref, qi_ref, kr_ref, ki_ref, o_ref):
    qr, qi = qr_ref[...], qi_ref[...]
    kr, ki = kr_ref[...], ki_ref[...]
    dn_qk = (((1,), (1,)), ((0,), (0,)))          # contract E, batch G
    s_rr = lax.dot_general(qr, kr, dn_qk, preferred_element_type=jnp.float32)
    s_ii = lax.dot_general(qi, ki, dn_qk, preferred_element_type=jnp.float32)
    s_ri = lax.dot_general(qr, ki, dn_qk, preferred_element_type=jnp.float32)
    s_ir = lax.dot_general(qi, kr, dn_qk, preferred_element_type=jnp.float32)
    # Reference semantics: elementwise tanh on the real / imaginary parts.
    a_re = jnp.tanh(s_rr - s_ii)                  # (gb, mq, mkv)
    a_im = jnp.tanh(s_ri + s_ir)
    dn_av = (((2,), (2,)), ((0,), (0,)))          # contract mkv, batch G
    o_re = (lax.dot_general(kr, a_re, dn_av, preferred_element_type=jnp.float32)
            - lax.dot_general(ki, a_im, dn_av, preferred_element_type=jnp.float32))
    o_im = (lax.dot_general(ki, a_re, dn_av, preferred_element_type=jnp.float32)
            + lax.dot_general(kr, a_im, dn_av, preferred_element_type=jnp.float32))
    o_ref[...] = jnp.concatenate([o_re, o_im], axis=-1)   # packed [re | im], lane-dense


def _fourier_attn_core_xla(qr, qi, kr, ki):
    s_rr = jnp.einsum('gex,gey->gxy', qr, kr)
    s_ii = jnp.einsum('gex,gey->gxy', qi, ki)
    s_ri = jnp.einsum('gex,gey->gxy', qr, ki)
    s_ir = jnp.einsum('gex,gey->gxy', qi, kr)
    a_re = jnp.tanh(s_rr - s_ii)
    a_im = jnp.tanh(s_ri + s_ir)
    o_re = jnp.einsum('gxy,gey->gex', a_re, kr) - jnp.einsum('gxy,gey->gex', a_im, ki)
    o_im = jnp.einsum('gxy,gey->gex', a_re, ki) + jnp.einsum('gxy,gey->gex', a_im, kr)
    return jnp.concatenate([o_re, o_im], axis=-1)


def fourier_attn_core(qr, qi, kr, ki):
    """Batched complex QK^T -> tanh(re)/tanh(im) -> (.)K.  Returns (G, E, 2*mq)=[re|im]."""
    G, E, mq = qr.shape
    mkv = kr.shape[2]
    if G * E * mq * mkv < _MIN_WORK_FOR_PALLAS_ATTN:
        return _fourier_attn_core_xla(qr, qi, kr, ki)
    per_group_bytes = 4 * (2 * E * mq + 2 * E * mkv + 6 * mq * mkv + 6 * E * mq)
    gb = _group_tile(G, per_group_bytes)
    block_bytes = gb * per_group_bytes
    return pl.pallas_call(
        _fourier_attn_kernel,
        out_shape=jax.ShapeDtypeStruct((G, E, 2 * mq), jnp.float32),
        grid=(pl.cdiv(G, gb),),
        in_specs=[pl.BlockSpec((gb, E, mq), lambda g: (g, 0, 0)),
                  pl.BlockSpec((gb, E, mq), lambda g: (g, 0, 0)),
                  pl.BlockSpec((gb, E, mkv), lambda g: (g, 0, 0)),
                  pl.BlockSpec((gb, E, mkv), lambda g: (g, 0, 0))],
        out_specs=pl.BlockSpec((gb, E, 2 * mq), lambda g: (g, 0, 0)),
        compiler_params=_mosaic_params(block_bytes),
    )(qr, qi, kr, ki)


# ----------------------------------------------------------------------------
# Module pieces (glue in plain JAX, hot paths via the kernels above)
# ----------------------------------------------------------------------------
def fourier_cross_attention(q, k, v, modes, in_channels, out_channels,
                            activation='tanh'):
    """FourierCrossAttentionW.forward; q,k,v: (B, L, E, H) f32 -> (B, L, E, H) f32."""
    if activation != 'tanh':
        # TODO(synk): softmax-activation branch of FourierCrossAttentionW not implemented.
        raise NotImplementedError(activation)
    B, Lq, E, H = q.shape
    Lkv = v.shape[1]
    m_q = min(Lq // 2, modes)
    m_kv = min(Lkv // 2, modes)
    if m_q == 0 or m_kv == 0:
        return jnp.zeros_like(q)          # out_ft all-zero -> irfft gives zeros
    xq = jnp.transpose(q, (0, 3, 2, 1))   # (B, H, E, L)
    xk = jnp.transpose(k, (0, 3, 2, 1))
    # TODO(synk): rFFT / irFFT have no Pallas equivalent; stays in plain JAX (XLA).
    xq_ft = jnp.fft.rfft(xq, axis=-1)[..., :m_q]
    xk_ft = jnp.fft.rfft(xk, axis=-1)[..., :m_kv]
    G = B * H
    qr = jnp.real(xq_ft).astype(jnp.float32).reshape(G, E, m_q)
    qi = jnp.imag(xq_ft).astype(jnp.float32).reshape(G, E, m_q)
    kr = jnp.real(xk_ft).astype(jnp.float32).reshape(G, E, m_kv)
    ki = jnp.imag(xk_ft).astype(jnp.float32).reshape(G, E, m_kv)
    o_cat = fourier_attn_core(qr, qi, kr, ki)                 # (G, E, 2*m_q)
    o = (o_cat[..., :m_q] + 1j * o_cat[..., m_q:]).reshape(B, H, E, m_q)
    out_ft = jnp.zeros((B, H, E, Lq // 2 + 1), dtype=jnp.complex64)
    out_ft = out_ft.at[..., :m_q].set(o)
    out = jnp.fft.irfft(out_ft / in_channels / out_channels, n=Lq, axis=-1)
    return jnp.transpose(out, (0, 3, 2, 1)).astype(jnp.float32)


def wavelet_transform(x, w_ds_big, c, kk):
    """x:(Bt,Nl,c,k) -> (d, s) each (Bt,Nl//2,c,k).
    Even/odd de-interleave is a pure reshape; the filter is one lane-dense
    block-diagonal (2ck x 2ck) matmul."""
    Bt, Nl, _, _ = x.shape
    flat = x.reshape(Bt * (Nl // 2), 2 * c * kk)
    out = filter_matmul(flat, w_ds_big).reshape(Bt, Nl // 2, c, 2 * kk)
    return out[..., :kk], out[..., kk:]


def even_odd(x, w_eo_big, c, kk):
    """x:(Bt,Nl,c,2k) -> interleaved (Bt,2Nl,c,k); re-interleave is a pure reshape."""
    Bt, Nl, _, ich2 = x.shape
    assert ich2 == 2 * kk
    flat = x.reshape(Bt * Nl, 2 * c * kk)
    out = filter_matmul(flat, w_eo_big)               # (rows, 2ck) = [e (ck) | o (ck)]
    return out.reshape(Bt, Nl, 2, c, kk).reshape(Bt, 2 * Nl, c, kk)


def multi_wavelet_cross_forward(params, q, k, v, cfg):
    c, kk, L, modes, ich = cfg['c'], cfg['k'], cfg['L'], cfg['modes'], cfg['ich']
    B, N, H, E = q.shape
    _, S, _, _ = k.shape

    # Lq / Lk / Lv projections: three row-tiled pallas_calls (no stacked HBM copy).
    q = linear_pallas(q.reshape(B * N, H * E), params['Wq_t'], params['bq']).reshape(B, N, c, kk)
    k = linear_pallas(k.reshape(B * S, H * E), params['Wk_t'], params['bk']).reshape(B, S, c, kk)
    v = linear_pallas(v.reshape(B * S, H * E), params['Wv_t'], params['bv']).reshape(B, S, c, kk)

    if N > S:
        zeros = jnp.zeros_like(q[:, :N - S])
        v = jnp.concatenate([v, zeros], axis=1)
        k = jnp.concatenate([k, zeros], axis=1)
    else:
        v = v[:, :N]
        k = k[:, :N]

    ns = math.floor(np.log2(N))
    nl = pow(2, math.ceil(np.log2(N)))
    if nl > N:
        q = jnp.concatenate([q, q[:, :nl - N]], axis=1)
        k = jnp.concatenate([k, k[:, :nl - N]], axis=1)
        v = jnp.concatenate([v, v[:, :nl - N]], axis=1)

    attn = functools.partial(fourier_cross_attention, modes=modes,
                             in_channels=cfg['in_channels'],
                             out_channels=cfg['out_channels'],
                             activation=cfg['activation'])

    Ud, Us = [], []
    for _ in range(ns - L):
        dq, q = wavelet_transform(q, params['W_ds_big'], c, kk)
        dk, k = wavelet_transform(k, params['W_ds_big'], c, kk)
        dv, v = wavelet_transform(v, params['W_ds_big'], c, kk)
        # d-branch and s-branch attentions fused into one batched call:
        # FourierCrossAttentionW is parameter-free, so attn1 == attn2 == attn3.
        a_ds = attn(jnp.concatenate([dq, q], axis=0),
                    jnp.concatenate([dk, k], axis=0),
                    jnp.concatenate([dv, v], axis=0))
        a_d, a_s = a_ds[:B], a_ds[B:]
        Ud.append(a_d + a_s)              # = attn1(d...) + attn2(s...)
        Us.append(a_d)                    # = attn3(d...)
    v = attn(q, k, v)                     # attn4

    for i in range(ns - 1 - L, -1, -1):
        v = v + Us[i]
        v = jnp.concatenate([v, Ud[i]], axis=-1)
        v = even_odd(v, params['W_eo_big'], c, kk)

    out = linear_pallas(v[:, :N].reshape(B * N, c * kk),
                        params['Wout_t'], params['bout'])
    return out.reshape(B, N, ich)


# ----------------------------------------------------------------------------
# Deterministic parameter initialization / preparation
# ----------------------------------------------------------------------------
def init_params(key, ich, c, kk):
    ks = jax.random.split(key, 12)

    def linear_init(kw, kb, nout, nin):
        bound = 1.0 / math.sqrt(nin)
        W = jax.random.uniform(kw, (nout, nin), jnp.float32, -bound, bound)
        b = jax.random.uniform(kb, (nout,), jnp.float32, -bound, bound)
        return W, b

    Wq, bq = linear_init(ks[0], ks[1], c * kk, ich)
    Wk, bk = linear_init(ks[2], ks[3], c * kk, ich)
    Wv, bv = linear_init(ks[4], ks[5], c * kk, ich)
    Wout, bout = linear_init(ks[6], ks[7], ich, c * kk)
    # TODO(synk): the real Legendre filter buffers (H0/H1/G0/G1 from sympy/scipy) are
    # numeric constants; deterministic random stand-ins keep the same shapes/structure.
    ec_s = 0.3 * jax.random.normal(ks[8], (2 * kk, kk), dtype=jnp.float32)
    ec_d = 0.3 * jax.random.normal(ks[9], (2 * kk, kk), dtype=jnp.float32)
    rc_e = 0.3 * jax.random.normal(ks[10], (2 * kk, kk), dtype=jnp.float32)
    rc_o = 0.3 * jax.random.normal(ks[11], (2 * kk, kk), dtype=jnp.float32)
    return dict(Wq=Wq, bq=bq, Wk=Wk, bk=bk, Wv=Wv, bv=bv, Wout=Wout, bout=bout,
                ec_s=ec_s, ec_d=ec_d, rc_e=rc_e, rc_o=rc_o)


def prepare_params(raw, c, kk):
    """Pre-transpose projection weights and pre-expand the wavelet / evenOdd filters
    into lane-dense block-diagonal kron(I_c, .) weights (done once, not per call)."""
    eye_c = jnp.eye(c, dtype=jnp.float32)
    w_ds = jnp.concatenate([raw['ec_d'], raw['ec_s']], axis=1)        # (2k, 2k) [d|s]
    # rows: [even feats (c*k) | odd feats (c*k)], cols: channel-major [d(k)|s(k)]
    w_ds_big = jnp.concatenate([jnp.kron(eye_c, w_ds[:kk]),
                                jnp.kron(eye_c, w_ds[kk:])], axis=0)  # (2ck, 2ck)
    # rows: channel-major 2k feats, cols: [even outputs (c*k) | odd outputs (c*k)]
    w_eo_big = jnp.concatenate([jnp.kron(eye_c, raw['rc_e']),
                                jnp.kron(eye_c, raw['rc_o'])], axis=1)  # (2ck, 2ck)
    return dict(Wq_t=raw['Wq'].T, bq=raw['bq'],
                Wk_t=raw['Wk'].T, bk=raw['bk'],
                Wv_t=raw['Wv'].T, bv=raw['bv'],
                Wout_t=raw['Wout'].T, bout=raw['bout'],
                W_ds_big=w_ds_big, W_eo_big=w_eo_big)


if __name__ == "__main__":
    # small shapes consistent with the module: (B, N, H, E), ich = H*E
    B, N, H, E = 2, 16, 4, 8
    S = 16
    ich = H * E                     # 32
    c, kk = 4, 4                    # c * k = 16
    modes = 4
    L = 0
    cfg = dict(c=c, k=kk, L=L, modes=modes, ich=ich,
               in_channels=ich, out_channels=ich, activation='tanh')

    key = jax.random.PRNGKey(0)
    pkey, qkey, kkey, vkey = jax.random.split(key, 4)
    raw = init_params(pkey, ich, c, kk)
    params = prepare_params(raw, c, kk)

    q = jax.random.normal(qkey, (B, N, H, E), dtype=jnp.float32)
    k = jax.random.normal(kkey, (B, S, H, E), dtype=jnp.float32)
    v = jax.random.normal(vkey, (B, S, H, E), dtype=jnp.float32)

    fwd = jax.jit(functools.partial(multi_wavelet_cross_forward, cfg=cfg))
    out = jax.block_until_ready(fwd(params, q, k, v))
    assert out.shape == (B, N, ich), out.shape
    assert bool(jnp.all(jnp.isfinite(out)))
    print("KERNEL_OK")
</pallas_src>

<mosaic_0001>
module attributes {stable_mosaic.version = 11 : i64} {
  func.func @_matmul_kernel(%arg0: i32, %arg1: memref<16x32xf32, #tpu.memory_space<vmem>>, %arg2: memref<32x32xf32, #tpu.memory_space<vmem>>, %arg3: memref<16x32xf32, #tpu.memory_space<vmem>>) attributes {dimension_semantics = [#tpu.dimension_semantics<parallel>], iteration_bounds = array<i64: 1>, scalar_prefetch = 0 : i64, scratch_operands = 0 : i64, tpu.core_type = #tpu.core_type<tc>, window_params = [{transform_indices = @transform_0, window_bounds = array<i64: 16, 32>}, {pipeline_mode = #tpu.pipeline_mode<synchronous>, transform_indices = @transform_1, window_bounds = array<i64: 32, 32>}, {transform_indices = @transform_2, window_bounds = array<i64: 16, 32>}]} {
    %c0 = arith.constant 0 : index
    %c0_0 = arith.constant 0 : index
    %0 = vector.load %arg1[%c0, %c0_0] : memref<16x32xf32, #tpu.memory_space<vmem>>, vector<16x32xf32>
    %c0_1 = arith.constant 0 : index
    %c0_2 = arith.constant 0 : index
    %1 = vector.load %arg2[%c0_1, %c0_2] : memref<32x32xf32, #tpu.memory_space<vmem>>, vector<32x32xf32>
    %cst = arith.constant dense<0.000000e+00> : vector<16x32xf32>
    %2 = tpu.matmul %0, %1, %cst {dimension_numbers = #tpu.dot_dimension_numbers<[1], [0], [0], [1], [0, 0, 1, 1], [], []>} : vector<16x32xf32>, vector<32x32xf32>, vector<16x32xf32> -> vector<16x32xf32>
    %c0_3 = arith.constant 0 : index
    %c0_4 = arith.constant 0 : index
    %3 = vector.load %arg3[%c0_3, %c0_4] : memref<16x32xf32, #tpu.memory_space<vmem>>, vector<16x32xf32>
    tpu.vector_store %arg3[%c0_3, %c0_4], %2 {strides = array<i32>} : memref<16x32xf32, #tpu.memory_space<vmem>>, vector<16x32xf32>,
    return
  }
  func.func @transform_0(%arg0: i32) -> (i32, i32) {
    %c0_i32 = arith.constant 0 : i32
    %c0_i32_0 = arith.constant 0 : i32
    return %arg0, %c0_i32 : i32, i32
  }
  func.func @transform_1(%arg0: i32) -> (i32, i32) {
    %c0_i32 = arith.constant 0 : i32
    %c0_i32_0 = arith.constant 0 : i32
    %c0_i32_1 = arith.constant 0 : i32
    return %c0_i32, %c0_i32_0 : i32, i32
  }
  func.func @transform_2(%arg0: i32) -> (i32, i32) {
    %c0_i32 = arith.constant 0 : i32
    %c0_i32_0 = arith.constant 0 : i32
    return %arg0, %c0_i32 : i32, i32
  }
}

module attributes {stable_mosaic.version = 11 : i64} {
  func.func @_linear_kernel(%arg0: i32, %arg1: memref<32x32xf32, #tpu.memory_space<vmem>>, %arg2: memref<32x16xf32, #tpu.memory_space<vmem>>, %arg3: memref<1x16xf32, #tpu.memory_space<vmem>>, %arg4: memref<32x16xf32, #tpu.memory_space<vmem>>) attributes {dimension_semantics = [#tpu.dimension_semantics<parallel>], iteration_bounds = array<i64: 1>, scalar_prefetch = 0 : i64, scratch_operands = 0 : i64, tpu.core_type = #tpu.core_type<tc>, window_params = [{transform_indices = @transform_0, window_bounds = array<i64: 32, 32>}, {pipeline_mode = #tpu.pipeline_mode<synchronous>, transform_indices = @transform_1, window_bounds = array<i64: 32, 16>}, {pipeline_mode = #tpu.pipeline_mode<synchronous>, transform_indices = @transform_2, window_bounds = array<i64: 1, 16>}, {transform_indices = @transform_3, window_bounds = array<i64: 32, 16>}]} {
    %c0 = arith.constant 0 : index
    %c0_0 = arith.constant 0 : index
    %0 = vector.load %arg1[%c0, %c0_0] : memref<32x32xf32, #tpu.memory_space<vmem>>, vector<32x32xf32>
    %c0_1 = arith.constant 0 : index
    %c0_2 = arith.constant 0 : index
    %1 = vector.load %arg2[%c0_1, %c0_2] : memref<32x16xf32, #tpu.memory_space<vmem>>, vector<32x16xf32>
    %cst = arith.constant dense<0.000000e+00> : vector<32x16xf32>
    %2 = tpu.matmul %0, %1, %cst {dimension_numbers = #tpu.dot_dimension_numbers<[1], [0], [0], [1], [0, 0, 1, 1], [], []>} : vector<32x32xf32>, vector<32x16xf32>, vector<32x16xf32> -> vector<32x16xf32>
    %c0_3 = arith.constant 0 : index
    %c0_4 = arith.constant 0 : index
    %3 = vector.load %arg3[%c0_3, %c0_4] : memref<1x16xf32, #tpu.memory_space<vmem>>, vector<1x16xf32>
    %4 = vector.broadcast %3 : vector<1x16xf32> to vector<32x16xf32>
    %5 = arith.addf %2, %4 : vector<32x16xf32>
    %c0_5 = arith.constant 0 : index
    %c0_6 = arith.constant 0 : index
    %6 = vector.load %arg4[%c0_5, %c0_6] : memref<32x16xf32, #tpu.memory_space<vmem>>, vector<32x16xf32>
    tpu.vector_store %arg4[%c0_5, %c0_6], %5 {strides = array<i32>} : memref<32x16xf32, #tpu.memory_space<vmem>>, vector<32x16xf32>,
    return
  }
  func.func @transform_0(%arg0: i32) -> (i32, i32) {
    %c0_i32 = arith.constant 0 : i32
    %c0_i32_0 = arith.constant 0 : i32
    return %arg0, %c0_i32 : i32, i32
  }
  func.func @transform_1(%arg0: i32) -> (i32, i32) {
    %c0_i32 = arith.constant 0 : i32
    %c0_i32_0 = arith.constant 0 : i32
    %c0_i32_1 = arith.constant 0 : i32
    return %c0_i32, %c0_i32_0 : i32, i32
  }
  func.func @transform_2(%arg0: i32) -> (i32, i32) {
    %c0_i32 = arith.constant 0 : i32
    %c0_i32_0 = arith.constant 0 : i32
    %c0_i32_1 = arith.constant 0 : i32
    return %c0_i32, %c0_i32_0 : i32, i32
  }
  func.func @transform_3(%arg0: i32) -> (i32, i32) {
    %c0_i32 = arith.constant 0 : i32
    %c0_i32_0 = arith.constant 0 : i32
    return %arg0, %c0_i32 : i32, i32
  }
}

module attributes {stable_mosaic.version = 11 : i64} {
  func.func @_fourier_attn_kernel(%arg0: i32, %arg1: memref<16x4x4xf32, #tpu.memory_space<vmem>>, %arg2: memref<16x4x4xf32, #tpu.memory_space<vmem>>, %arg3: memref<16x4x4xf32, #tpu.memory_space<vmem>>, %arg4: memref<16x4x4xf32, #tpu.memory_space<vmem>>, %arg5: memref<16x4x8xf32, #tpu.memory_space<vmem>>) attributes {dimension_semantics = [#tpu.dimension_semantics<parallel>], iteration_bounds = array<i64: 1>, scalar_prefetch = 0 : i64, scratch_operands = 0 : i64, tpu.core_type = #tpu.core_type<tc>, window_params = [{transform_indices = @transform_0, window_bounds = array<i64: 16, 4, 4>}, {transform_indices = @transform_1, window_bounds = array<i64: 16, 4, 4>}, {transform_indices = @transform_2, window_bounds = array<i64: 16, 4, 4>}, {transform_indices = @transform_3, window_bounds = array<i64: 16, 4, 4>}, {transform_indices = @transform_4, window_bounds = array<i64: 16, 4, 8>}]} {
    %c0 = arith.constant 0 : index
    %c0_0 = arith.constant 0 : index
    %c0_1 = arith.constant 0 : index
    %0 = vector.load %arg1[%c0, %c0_0, %c0_1] : memref<16x4x4xf32, #tpu.memory_space<vmem>>, vector<16x4x4xf32>
    %c0_2 = arith.constant 0 : index
    %c0_3 = arith.constant 0 : index
    %c0_4 = arith.constant 0 : index
    %1 = vector.load %arg2[%c0_2, %c0_3, %c0_4] : memref<16x4x4xf32, #tpu.memory_space<vmem>>, vector<16x4x4xf32>
    %c0_5 = arith.constant 0 : index
    %c0_6 = arith.constant 0 : index
    %c0_7 = arith.constant 0 : index
    %2 = vector.load %arg3[%c0_5, %c0_6, %c0_7] : memref<16x4x4xf32, #tpu.memory_space<vmem>>, vector<16x4x4xf32>
    %c0_8 = arith.constant 0 : index
    %c0_9 = arith.constant 0 : index
    %c0_10 = arith.constant 0 : index
    %3 = vector.load %arg4[%c0_8, %c0_9, %c0_10] : memref<16x4x4xf32, #tpu.memory_space<vmem>>, vector<16x4x4xf32>
    %cst = arith.constant dense<0.000000e+00> : vector<16x4x4xf32>
    %4 = tpu.matmul %0, %2, %cst {dimension_numbers = #tpu.dot_dimension_numbers<[1], [1], [2], [2], [0, 0, 0, 2, 1, 2], [0], [0]>} : vector<16x4x4xf32>, vector<16x4x4xf32>, vector<16x4x4xf32> -> vector<16x4x4xf32>
    %cst_11 = arith.constant dense<0.000000e+00> : vector<16x4x4xf32>
    %5 = tpu.matmul %1, %3, %cst_11 {dimension_numbers = #tpu.dot_dimension_numbers<[1], [1], [2], [2], [0, 0, 0, 2, 1, 2], [0], [0]>} : vector<16x4x4xf32>, vector<16x4x4xf32>, vector<16x4x4xf32> -> vector<16x4x4xf32>
    %cst_12 = arith.constant dense<0.000000e+00> : vector<16x4x4xf32>
    %6 = tpu.matmul %0, %3, %cst_12 {dimension_numbers = #tpu.dot_dimension_numbers<[1], [1], [2], [2], [0, 0, 0, 2, 1, 2], [0], [0]>} : vector<16x4x4xf32>, vector<16x4x4xf32>, vector<16x4x4xf32> -> vector<16x4x4xf32>
    %cst_13 = arith.constant dense<0.000000e+00> : vector<16x4x4xf32>
    %7 = tpu.matmul %1, %2, %cst_13 {dimension_numbers = #tpu.dot_dimension_numbers<[1], [1], [2], [2], [0, 0, 0, 2, 1, 2], [0], [0]>} : vector<16x4x4xf32>, vector<16x4x4xf32>, vector<16x4x4xf32> -> vector<16x4x4xf32>
    %8 = arith.subf %4, %5 : vector<16x4x4xf32>
    %9 = math.tanh %8 : vector<16x4x4xf32>
    %10 = arith.addf %6, %7 : vector<16x4x4xf32>
    %11 = math.tanh %10 : vector<16x4x4xf32>
    %cst_14 = arith.constant dense<0.000000e+00> : vector<16x4x4xf32>
    %12 = tpu.matmul %2, %9, %cst_14 {dimension_numbers = #tpu.dot_dimension_numbers<[2], [2], [1], [1], [0, 0, 0, 1, 1, 1], [0], [0]>} : vector<16x4x4xf32>, vector<16x4x4xf32>, vector<16x4x4xf32> -> vector<16x4x4xf32>
    %cst_15 = arith.constant dense<0.000000e+00> : vector<16x4x4xf32>
    %13 = tpu.matmul %3, %11, %cst_15 {dimension_numbers = #tpu.dot_dimension_numbers<[2], [2], [1], [1], [0, 0, 0, 1, 1, 1], [0], [0]>} : vector<16x4x4xf32>, vector<16x4x4xf32>, vector<16x4x4xf32> -> vector<16x4x4xf32>
    %14 = arith.subf %12, %13 : vector<16x4x4xf32>
    %cst_16 = arith.constant dense<0.000000e+00> : vector<16x4x4xf32>
    %15 = tpu.matmul %3, %9, %cst_16 {dimension_numbers = #tpu.dot_dimension_numbers<[2], [2], [1], [1], [0, 0, 0, 1, 1, 1], [0], [0]>} : vector<16x4x4xf32>, vector<16x4x4xf32>, vector<16x4x4xf32> -> vector<16x4x4xf32>
    %cst_17 = arith.constant dense<0.000000e+00> : vector<16x4x4xf32>
    %16 = tpu.matmul %2, %11, %cst_17 {dimension_numbers = #tpu.dot_dimension_numbers<[2], [2], [1], [1], [0, 0, 0, 1, 1, 1], [0], [0]>} : vector<16x4x4xf32>, vector<16x4x4xf32>, vector<16x4x4xf32> -> vector<16x4x4xf32>
    %17 = arith.addf %15, %16 : vector<16x4x4xf32>
    %18 = tpu.concatenate %14, %17 in 2 : vector<16x4x4xf32>, vector<16x4x4xf32> -> vector<16x4x8xf32>
    %c0_18 = arith.constant 0 : index
    %c0_19 = arith.constant 0 : index
    %c0_20 = arith.constant 0 : index
    %19 = vector.load %arg5[%c0_18, %c0_19, %c0_20] : memref<16x4x8xf32, #tpu.memory_space<vmem>>, vector<16x4x8xf32>
    tpu.vector_store %arg5[%c0_18, %c0_19, %c0_20], %18 {strides = array<i32>} : memref<16x4x8xf32, #tpu.memory_space<vmem>>, vector<16x4x8xf32>,
    return
  }
  func.func @transform_0(%arg0: i32) -> (i32, i32, i32) {
    %c0_i32 = arith.constant 0 : i32
    %c0_i32_0 = arith.constant 0 : i32
    %c0_i32_1 = arith.constant 0 : i32
    return %arg0, %c0_i32, %c0_i32_0 : i32, i32, i32
  }
  func.func @transform_1(%arg0: i32) -> (i32, i32, i32) {
    %c0_i32 = arith.constant 0 : i32
    %c0_i32_0 = arith.constant 0 : i32
    %c0_i32_1 = arith.constant 0 : i32
    return %arg0, %c0_i32, %c0_i32_0 : i32, i32, i32
  }
  func.func @transform_2(%arg0: i32) -> (i32, i32, i32) {
    %c0_i32 = arith.constant 0 : i32
    %c0_i32_0 = arith.constant 0 : i32
    %c0_i32_1 = arith.constant 0 : i32
    return %arg0, %c0_i32, %c0_i32_0 : i32, i32, i32
  }
  func.func @transform_3(%arg0: i32) -> (i32, i32, i32) {
    %c0_i32 = arith.constant 0 : i32
    %c0_i32_0 = arith.constant 0 : i32
    %c0_i32_1 = arith.constant 0 : i32
    return %arg0, %c0_i32, %c0_i32_0 : i32, i32, i32
  }
  func.func @transform_4(%arg0: i32) -> (i32, i32, i32) {
    %c0_i32 = arith.constant 0 : i32
    %c0_i32_0 = arith.constant 0 : i32
    %c0_i32_1 = arith.constant 0 : i32
    return %arg0, %c0_i32, %c0_i32_0 : i32, i32, i32
  }
}

module attributes {stable_mosaic.version = 11 : i64} {
  func.func @_linear_kernel(%arg0: i32, %arg1: memref<32x16xf32, #tpu.memory_space<vmem>>, %arg2: memref<16x32xf32, #tpu.memory_space<vmem>>, %arg3: memref<1x32xf32, #tpu.memory_space<vmem>>, %arg4: memref<32x32xf32, #tpu.memory_space<vmem>>) attributes {dimension_semantics = [#tpu.dimension_semantics<parallel>], iteration_bounds = array<i64: 1>, scalar_prefetch = 0 : i64, scratch_operands = 0 : i64, tpu.core_type = #tpu.core_type<tc>, window_params = [{transform_indices = @transform_0, window_bounds = array<i64: 32, 16>}, {pipeline_mode = #tpu.pipeline_mode<synchronous>, transform_indices = @transform_1, window_bounds = array<i64: 16, 32>}, {pipeline_mode = #tpu.pipeline_mode<synchronous>, transform_indices = @transform_2, window_bounds = array<i64: 1, 32>}, {transform_indices = @transform_3, window_bounds = array<i64: 32, 32>}]} {
    %c0 = arith.constant 0 : index
    %c0_0 = arith.constant 0 : index
    %0 = vector.load %arg1[%c0, %c0_0] : memref<32x16xf32, #tpu.memory_space<vmem>>, vector<32x16xf32>
    %c0_1 = arith.constant 0 : index
    %c0_2 = arith.constant 0 : index
    %1 = vector.load %arg2[%c0_1, %c0_2] : memref<16x32xf32, #tpu.memory_space<vmem>>, vector<16x32xf32>
    %cst = arith.constant dense<0.000000e+00> : vector<32x32xf32>
    %2 = tpu.matmul %0, %1, %cst {dimension_numbers = #tpu.dot_dimension_numbers<[1], [0], [0], [1], [0, 0, 1, 1], [], []>} : vector<32x16xf32>, vector<16x32xf32>, vector<32x32xf32> -> vector<32x32xf32>
    %c0_3 = arith.constant 0 : index
    %c0_4 = arith.constant 0 : index
    %3 = vector.load %arg3[%c0_3, %c0_4] : memref<1x32xf32, #tpu.memory_space<vmem>>, vector<1x32xf32>
    %4 = vector.broadcast %3 : vector<1x32xf32> to vector<32x32xf32>
    %5 = arith.addf %2, %4 : vector<32x32xf32>
    %c0_5 = arith.constant 0 : index
    %c0_6 = arith.constant 0 : index
    %6 = vector.load %arg4[%c0_5, %c0_6] : memref<32x32xf32, #tpu.memory_space<vmem>>, vector<32x32xf32>
    tpu.vector_store %arg4[%c0_5, %c0_6], %5 {strides = array<i32>} : memref<32x32xf32, #tpu.memory_space<vmem>>, vector<32x32xf32>,
    return
  }
  func.func @transform_0(%arg0: i32) -> (i32, i32) {
    %c0_i32 = arith.constant 0 : i32
    %c0_i32_0 = arith.constant 0 : i32
    return %arg0, %c0_i32 : i32, i32
  }
  func.func @transform_1(%arg0: i32) -> (i32, i32) {
    %c0_i32 = arith.constant 0 : i32
    %c0_i32_0 = arith.constant 0 : i32
    %c0_i32_1 = arith.constant 0 : i32
    return %c0_i32, %c0_i32_0 : i32, i32
  }
  func.func @transform_2(%arg0: i32) -> (i32, i32) {
    %c0_i32 = arith.constant 0 : i32
    %c0_i32_0 = arith.constant 0 : i32
    %c0_i32_1 = arith.constant 0 : i32
    return %c0_i32, %c0_i32_0 : i32, i32
  }
  func.func @transform_3(%arg0: i32) -> (i32, i32) {
    %c0_i32 = arith.constant 0 : i32
    %c0_i32_0 = arith.constant 0 : i32
    return %arg0, %c0_i32 : i32, i32
  }
}

</mosaic_0001>

<bundles_post_ra>
// kernel: multi_wavelet_cross_forward.10
= control target key start
LH: loop header
LB: loop body
LE: loop exit
PB: predicated region body
PF: predicated region fallthrough
CT: control target
= control target key end

     0   :  { %vm17_vm0 = vcmask 261120   ;;  %s167_s1 = inlined_call_operand.vmem [shape: f32[32,32], index: 1, kind: input, shape index: {}]   ;;  %s168_s0 = inlined_call_operand.vmem [shape: f32[16,32], index: 0, kind: input, shape index: {}]   ;;  %s169_s2 = inlined_call_operand.vmem [shape: f32[16,32], index: 2, kind: output, shape index: {}]  }
   0x1   :  { %v16_v0 = vld [vmem:[%s167_s1 + $0x18] sm:$0xff]  ;;  %v15_v1 = vld [vmem:[%s167_s1 + $0x10] sm:$0xff]  ;;  %v11_v2 = vld [vmem:[%s168_s0] sm:$0xff] }
   0x2   :  { %113 = vmatprep.subr.mxu0 %v16_v0  ;;  %v14_v3 = vld [vmem:[%s167_s1 + $0x8] sm:$0xff]  ;;  %121 = vmatprep.mubr.msk.f32.mxu0 %vm17_vm0, %v11_v2  ;;  %v13_v4 = vld [vmem:[%s167_s1] sm:$0xff] }
   0x3   :  { %114 = vmatpush3.msra.mxu0 %v16_v0  ;;  %v12_v5 = vld [vmem:[%s168_s0 + $0x8] sm:$0xff] }
   0x4   :  { %115 = vmatprep.subr.mxu0 %v15_v1 }
   0x5   :  { %116 = vmatpush3.msra.mxu0 %v15_v1 }
   0x6   :  { %117 = vmatprep.subr.mxu0 %v14_v3 }
   0x7   :  { %118 = vmatpush3.msra.mxu0 %v14_v3 }
   0x8   :  { %119 = vmatprep.subr.mxu0 %v13_v4 }
   0x9   :  { %120 = vmatpush3.msra.mxu0 %v13_v4 }
   0xa   :  { %122 = vmatmul.mubr.msk.f32.vlgmr.msra.gmra.mxu0 %vm17_vm0, %v12_v5 }
  0xca   :  { %v123_v6 = vpop.f32.mrf.mxu0 }
  0xcb   :  { %100 = vst.msk [vmem:[%s169_s2 + $0x8] sm:$0xff] %vm17_vm0, %v123_v6 }
  0xcc   :  { %v90_v7 = vpop.f32.mrf.mxu0 }
  0xcd   :  { %99 = vst.msk [vmem:[%s169_s2] sm:$0xff] %vm17_vm0, %v90_v7 }

// kernel: multi_wavelet_cross_forward.9
= control target key start
LH: loop header
LB: loop body
LE: loop exit
PB: predicated region body
PF: predicated region fallthrough
CT: control target
= control target key end

     0   :  { %vm29_vm0 = vcmask 261120   ;;  %vm127_vm1 = vcmask 130048   ;;  %s230_s1 = inlined_call_operand.vmem [shape: f32[32,16], index: 1, kind: input, shape index: {}]   ;;  %s231_s0 = inlined_call_operand.vmem [shape: f32[32,32], index: 0, kind: input, shape index: {}]   ;;  %s232_s2 = inlined_call_operand.vmem [shape: f32[1,16], index: 2, kind: input, shape index: {}]   ;;  %s233_s3 = inlined_call_operand.vmem [shape: f32[32,16], index: 3, kind: output, shape index: {}]  }
   0x1   :  { %v21_v0 = vld [vmem:[%s230_s1 + $0x18] sm:$0xff]  ;;  %v20_v1 = vld [vmem:[%s230_s1 + $0x10] sm:$0xff]  ;;  %v19_v2 = vld [vmem:[%s230_s1 + $0x8] sm:$0xff] }
   0x2   :  { %149 = vmatprep.subr.mxu0 %v21_v0  ;;  %163 = vmatprep.subr.mxu1 %v21_v0  ;;  %v18_v3 = vld [vmem:[%s230_s1] sm:$0xff]  ;;  %v16_v5 = vld [vmem:[%s231_s0 + $0x10] sm:$0xff]  ;;  %v15_v6 = vld [vmem:[%s231_s0 + $0x8] sm:$0xff] }
   0x3   :  { %150 = vmatpush3.msra.mxu0 %v21_v0  ;;  %167 = vmatpush3.msra.mxu1 %v21_v0  ;;  %v14_v4 = vld [vmem:[%s231_s0] sm:$0xff]  ;;  %v17_v7 = vld [vmem:[%s231_s0 + $0x18] sm:$0xff] }
   0x4   :  { %151 = vmatprep.subr.mxu0 %v20_v1  ;;  %164 = vmatprep.subr.mxu1 %v20_v1  ;;  %v136_v8 = vld [vmem:[%s232_s2] ss:$0 sm:$0xff] }
   0x5   :  { %152 = vmatpush3.msra.mxu0 %v20_v1  ;;  %168 = vmatpush3.msra.mxu1 %v20_v1 }
   0x6   :  { %153 = vmatprep.subr.mxu0 %v19_v2  ;;  %165 = vmatprep.subr.mxu1 %v19_v2 }
   0x7   :  { %154 = vmatpush3.msra.mxu0 %v19_v2  ;;  %169 = vmatpush3.msra.mxu1 %v19_v2 }
   0x8   :  { %155 = vmatprep.subr.mxu0 %v18_v3  ;;  %166 = vmatprep.subr.mxu1 %v18_v3 }
   0x9   :  { %156 = vmatpush3.msra.mxu0 %v18_v3  ;;  %170 = vmatpush3.msra.mxu1 %v18_v3 }
   0xa   :  { %157 = vmatprep.mubr.msk.f32.mxu0 %vm29_vm0, %v14_v4  ;;  %160 = vmatprep.mubr.msk.f32.mxu1 %vm29_vm0, %v16_v5 }
   0xb   :  { %158 = vmatmul.mubr.msk.f32.vlgmr.msra.gmra.mxu0 %vm29_vm0, %v15_v6  ;;  %161 = vmatmul.mubr.msk.f32.vlgmr.msra.gmra.mxu1 %vm29_vm0, %v17_v7 }
  0xcb   :  { %v159_v9 = vpop.f32.mrf.mxu0  ;;  %v162_v10 = vpop.f32.mrf.mxu1 }
  0xcc   :  { %v114_v11 = vadd.f32 %v159_v9, %v136_v8  ;;  %v124_v12 = vadd.f32 %v162_v10, %v136_v8 }
  0xcd   :  { %v108_v13 = vpop.f32.mrf.mxu0  ;;  %v118_v14 = vpop.f32.mrf.mxu1 }
  0xce   :  { %129 = vst.msk [vmem:[%s233_s3 + $0x8] sm:$0xff] %vm127_vm1, %v114_v11  ;;  %131 = vst.msk [vmem:[%s233_s3 + $0x18] sm:$0xff] %vm127_vm1, %v124_v12  ;;  %v109_v15 = vadd.f32 %v136_v8, %v108_v13  ;;  %v119_v16 = vadd.f32 %v136_v8, %v118_v14 }
  0xd0   :  { %128 = vst.msk [vmem:[%s233_s3] sm:$0xff] %vm127_vm1, %v109_v15  ;;  %130 = vst.msk [vmem:[%s233_s3 + $0x10] sm:$0xff] %vm127_vm1, %v119_v16 }

// kernel: reverse.1
= control target key start
LH: loop header
LB: loop body
LE: loop exit
PB: predicated region body
PF: predicated region fallthrough
CT: control target
= control target key end

     0   :  { %v2_v0 = vlaneseq  ;;  %s614_s0 = inlined_call_operand.vmem [shape: f32[4,4,4,3], index: 0, kind: input, shape index: {}]   ;;  %s615_s1 = inlined_call_operand.vmem [shape: f32[4,4,4,3], index: 1, kind: output, shape index: {}]  }
   0x2   :  { %v3_v1 = vsub.s32 2, %v2_v0 }
   0x4   :  { %4 = vset.pattern.permute.xlu0 %v3_v1 }
   0x5   :  { %528 = vset.pattern.permute.xlu1 %v3_v1  ;;  %v25_v2 = vld [vmem:[%s614_s0 + $0x8] sm:$0xff]   ;;  %v21_v3 = vld [vmem:[%s614_s0] sm:$0xff]   ;;  %v31_v4 = vld [vmem:[%s614_s0 + $0x14] sm:$0xff]  }
   0x6   :  { %26 = vst [vmem:[#allocation1 + $0x8] sm:$0xff] %v25_v2   ;;  %22 = vst [vmem:[#allocation1] sm:$0xff] %v21_v3   ;;  %v29_v5 = vld [vmem:[%s614_s0 + $0x10] sm:$0xf]  ;;  %v35_v6 = vld [vmem:[%s614_s0 + $0x1c] sm:$0xff]  }
   0x7   :  { %32 = vst [vmem:[#allocation1 + $0x14] sm:$0xff] %v31_v4   ;;  %v39_v7 = vld [vmem:[%s614_s0 + $0x24] sm:$0xff]   ;;  %30 = vst [vmem:[#allocation1 + $0x10] sm:$0xf] %v29_v5  ;;  %v43_v8 = vld [vmem:[%s614_s0 + $0x2c] sm:$0xff]  }
   0x8   :  { %36 = vst [vmem:[#allocation1 + $0x1c] sm:$0xff] %v35_v6   ;;  %40 = vst [vmem:[#allocation1 + $0x24] sm:$0xff] %v39_v7   ;;  %v47_v9 = vld [vmem:[%s614_s0 + $0x34] sm:$0xff]   ;;  %v51_v10 = vld [vmem:[%s614_s0 + $0x3c] sm:$0xf] }
   0x9   :  { %44 = vst [vmem:[#allocation1 + $0x2c] sm:$0xff] %v43_v8   ;;  %48 = vst [vmem:[#allocation1 + $0x34] sm:$0xff] %v47_v9  }
   0xa   :  { %52 = vst [vmem:[#allocation1 + $0x3c] sm:$0xf] %v51_v10 }
   0xd   :  { %v176_v11 = vld [vmem:[#allocation1 + $0x8] sm:$0xf]  ;;  %v183_v12 = vld [vmem:[#allocation1] sm:$0xf]  ;;  %v171_v13 = vld [vmem:[#allocation1 + $0xc] sm:$0xf] }
   0xe   :  { %178 = vst [vmem:[#allocation0 + $0x8] sm:$0xf] %v176_v11  ;;  %184 = vst [vmem:[#allocation0 + $0x50] sm:$0xf] %v183_v12  ;;  %v180_v14 = vld [vmem:[#allocation1 + $0x4] sm:$0xf] }
   0xf   :  { %173 = vst [vmem:[#allocation0 + $0x18] sm:$0xf] %v171_v13  ;;  %v161_v15 = vld [vmem:[#allocation1 + $0x14] sm:$0xf]  ;;  %v166_v16 = vld [vmem:[#allocation1 + $0x10] sm:$0xf] }
  0x10   :  { %182 = vst [vmem:[#allocation0] sm:$0xf] %v180_v14  ;;  %163 = vst [vmem:[#allocation0 + $0x68] sm:$0xf] %v161_v15  ;;  %v151_v17 = vld [vmem:[#allocation1 + $0x1c] sm:$0xf] }
  0x11   :  { %168 = vst [vmem:[#allocation0 + $0x40] sm:$0xf] %v166_v16  ;;  %v156_v18 = vld [vmem:[#allocation1 + $0x18] sm:$0xf]  ;;  %v141_v19 = vld [vmem:[#allocation1 + $0x24] sm:$0xf] }
  0x12   :  { %153 = vst [vmem:[#allocation0 + $0x38] sm:$0xf] %v151_v17  ;;  %158 = vst [vmem:[#allocation0 + $0x58] sm:$0xf] %v156_v18  ;;  %v146_v20 = vld [vmem:[#allocation1 + $0x20] sm:$0xf] }
  0x13   :  { %143 = vst [vmem:[#allocation0 + $0x70] sm:$0xf] %v141_v19  ;;  %v131_v21 = vld [vmem:[#allocation1 + $0x2c] sm:$0xf]  ;;  %v136_v22 = vld [vmem:[#allocation1 + $0x28] sm:$0xf] }
  0x14   :  { %148 = vst [vmem:[#allocation0 + $0x30] sm:$0xf] %v146_v20  ;;  %133 = vst [vmem:[#allocation0 + $0x28] sm:$0xf] %v131_v21  ;;  %v121_v23 = vld [vmem:[#allocation1 + $0x34] sm:$0xf] }
  0x15   :  { %138 = vst [vmem:[#allocation0 + $0x10] sm:$0xf] %v136_v22  ;;  %v126_v24 = vld [vmem:[#allocation1 + $0x30] sm:$0xf]  ;;  %v111_v25 = vld [vmem:[#allocation1 + $0x3c] sm:$0xf] }
  0x16   :  { %123 = vst [vmem:[#allocation0 + $0x20] sm:$0xf] %v121_v23  ;;  %128 = vst [vmem:[#allocation0 + $0x60] sm:$0xf] %v126_v24  ;;  %v116_v26 = vld [vmem:[#allocation1 + $0x38] sm:$0xf] }
  0x17   :  { %113 = vst [vmem:[#allocation0 + $0x48] sm:$0xf] %v111_v25  ;;  %118 = vst [vmem:[#allocation0 + $0x78] sm:$0xf] %v116_v26  ;;  %v197_v27 = vld [vmem:[#allocation0 + $0x8] sm:$0xff]  ;;  %v185_v28 = vld [vmem:[#allocation0 + $0x50] sm:$0xff] }
  0x18   :  { %198 = vperm.xlu1 %528, %v197_v27   ;;  %186 = vperm.xlu0 %4, %v185_v28   ;;  %v203_v29 = vld [vmem:[#allocation0 + $0x18] sm:$0xff]  ;;  %v191_v30 = vld [vmem:[#allocation0] sm:$0xff]  ;;  %v215_v31 = vld [vmem:[#allocation0 + $0x68] sm:$0xff] }
  0x19   :  { %v209_v32 = vld [vmem:[#allocation0 + $0x40] sm:$0xff]  ;;  %v227_v33 = vld [vmem:[#allocation0 + $0x38] sm:$0xff] }
  0x1a   :  { %v221_v34 = vld [vmem:[#allocation0 + $0x58] sm:$0xff]  ;;  %v239_v35 = vld [vmem:[#allocation0 + $0x70] sm:$0xff] }
  0x1b   :  { %v233_v36 = vld [vmem:[#allocation0 + $0x30] sm:$0xff]  ;;  %v251_v37 = vld [vmem:[#allocation0 + $0x28] sm:$0xff] }
  0x1c   :  { %204 = vperm.xlu1 %528, %v203_v29   ;;  %192 = vperm.xlu0 %4, %v191_v30   ;;  %v245_v38 = vld [vmem:[#allocation0 + $0x10] sm:$0xff] }
  0x1d   :  { %v263_v39 = vld [vmem:[#allocation0 + $0x20] sm:$0xff] }
  0x1e   :  { %v257_v40 = vld [vmem:[#allocation0 + $0x60] sm:$0xff]  ;;  %v275_v41 = vld [vmem:[#allocation0 + $0x48] sm:$0xff]  ;;  %v269_v42 = vld [vmem:[#allocation0 + $0x78] sm:$0xff] }
  0x20   :  { %216 = vperm.xlu1 %528, %v215_v31   ;;  %210 = vperm.xlu0 %4, %v209_v32  }
  0x24   :  { %228 = vperm.xlu1 %528, %v227_v33   ;;  %222 = vperm.xlu0 %4, %v221_v34  }
  0x28   :  { %240 = vperm.xlu1 %528, %v239_v35   ;;  %234 = vperm.xlu0 %4, %v233_v36  }
  0x2c   :  { %252 = vperm.xlu1 %528, %v251_v37   ;;  %246 = vperm.xlu0 %4, %v245_v38  }
  0x30   :  { %264 = vperm.xlu1 %528, %v263_v39   ;;  %258 = vperm.xlu0 %4, %v257_v40  }
  0x34   :  { %276 = vperm.xlu1 %528, %v275_v41   ;;  %270 = vperm.xlu0 %4, %v269_v42  }
  0x93   :  { %v199_v43 = vpop.permute.xlu1 %198  ;;  %v187_v44 = vpop.permute.xlu0 %186 }
  0x94   :  { %200 = vst [vmem:[#allocation2 + $0x10] sm:$0xff] %v199_v43  ;;  %188 = vst [vmem:[#allocation2 + $0x28] sm:$0xff] %v187_v44 }
  0x97   :  { %v205_v45 = vpop.permute.xlu1 %204  ;;  %v193_v46 = vpop.permute.xlu0 %192 }
  0x98   :  { %206 = vst [vmem:[#allocation2 + $0x40] sm:$0xff] %v205_v45  ;;  %194 = vst [vmem:[#allocation2 + $0x68] sm:$0xff] %v193_v46 }
  0x9b   :  { %v294_v47 = vld [vmem:[#allocation2 + $0x10] sm:$0xf]  ;;  %v283_v48 = vld [vmem:[#allocation2 + $0x28] sm:$0xf]  ;;  %v217_v49 = vpop.permute.xlu1 %216  ;;  %v211_v50 = vpop.permute.xlu0 %210 }
  0x9c   :  { %299 = vst [vmem:[#allocation3 + $0x8] sm:$0xf] %v294_v47  ;;  %286 = vst [vmem:[#allocation3] sm:$0xf] %v283_v48 }
  0x9d   :  { %218 = vst [vmem:[#allocation2 + $0x30] sm:$0xff] %v217_v49  ;;  %212 = vst [vmem:[#allocation2 + $0x48] sm:$0xff] %v211_v50 }
  0x9f   :  { %v301_v51 = vld [vmem:[#allocation2 + $0x40] sm:$0xf]  ;;  %v288_v52 = vld [vmem:[#allocation2 + $0x68] sm:$0xf]  ;;  %v229_v53 = vpop.permute.xlu1 %228  ;;  %v223_v54 = vpop.permute.xlu0 %222 }
  0xa0   :  { %306 = vst [vmem:[#allocation3 + $0xc] sm:$0xf] %v301_v51  ;;  %292 = vst [vmem:[#allocation3 + $0x4] sm:$0xf] %v288_v52 }
  0xa1   :  { %230 = vst [vmem:[#allocation2 + $0x38] sm:$0xff] %v229_v53  ;;  %224 = vst [vmem:[#allocation2 + $0x70] sm:$0xff] %v223_v54 }
  0xa3   :  { %v411_v55 = vld [vmem:[#allocation3 + $0x8] sm:$0xf]  ;;  %v407_v56 = vld [vmem:[#allocation3] sm:$0xf]  ;;  %v241_v58 = vpop.permute.xlu1 %240  ;;  %v235_v59 = vpop.permute.xlu0 %234 }
  0xa4   :  { %v315_v57 = vld [vmem:[#allocation2 + $0x30] sm:$0xf]  ;;  %412 = vst [vmem:[%s615_s1 + $0x8] sm:$0xf] %v411_v55  ;;  %408 = vst [vmem:[%s615_s1] sm:$0xf] %v407_v56 }
  0xa5   :  { %320 = vst [vmem:[#allocation3 + $0x14] sm:$0xf] %v315_v57  ;;  %v308_v60 = vld [vmem:[#allocation2 + $0x48] sm:$0xf]  ;;  %242 = vst [vmem:[#allocation2 + $0x78] sm:$0xff] %v241_v58 }
  0xa6   :  { %236 = vst [vmem:[#allocation2 + $0x20] sm:$0xff] %v235_v59  ;;  %313 = vst [vmem:[#allocation3 + $0x10] sm:$0xf] %v308_v60 }
  0xa7   :  { %v413_v61 = vld [vmem:[#allocation3 + $0xc] sm:$0xf]  ;;  %v409_v62 = vld [vmem:[#allocation3 + $0x4] sm:$0xf]  ;;  %v253_v0 = vpop.permute.xlu1 %252  ;;  %v247_v1 = vpop.permute.xlu0 %246 }
  0xa8   :  { %v329_v63 = vld [vmem:[#allocation2 + $0x38] sm:$0xf]  ;;  %414 = vst [vmem:[%s615_s1 + $0xc] sm:$0xf] %v413_v61  ;;  %410 = vst [vmem:[%s615_s1 + $0x4] sm:$0xf] %v409_v62 }
  0xa9   :  { %334 = vst [vmem:[#allocation3 + $0x1c] sm:$0xf] %v329_v63  ;;  %v322_v2 = vld [vmem:[#allocation2 + $0x70] sm:$0xf]  ;;  %254 = vst [vmem:[#allocation2 + $0x58] sm:$0xff] %v253_v0 }
  0xaa   :  { %248 = vst [vmem:[#allocation2 + $0x18] sm:$0xff] %v247_v1  ;;  %327 = vst [vmem:[#allocation3 + $0x18] sm:$0xf] %v322_v2 }
  0xab   :  { %v265_v6 = vpop.permute.xlu1 %264  ;;  %v259_v7 = vpop.permute.xlu0 %258 }
  0xac   :  { %v417_v3 = vld [vmem:[#allocation3 + $0x14] sm:$0xf]  ;;  %v343_v4 = vld [vmem:[#allocation2 + $0x78] sm:$0xf]  ;;  %266 = vst [vmem:[#allocation2 + $0x8] sm:$0xff] %v265_v6  ;;  %260 = vst [vmem:[#allocation2] sm:$0xff] %v259_v7 }
  0xad   :  { %v336_v5 = vld [vmem:[#allocation2 + $0x20] sm:$0xf]  ;;  %418 = vst [vmem:[%s615_s1 + $0x14] sm:$0xf] %v417_v3  ;;  %v415_v8 = vld [vmem:[#allocation3 + $0x10] sm:$0xf] }
  0xae   :  { %348 = vst [vmem:[#allocation3 + $0x24] sm:$0xf] %v343_v4  ;;  %341 = vst [vmem:[#allocation3 + $0x20] sm:$0xf] %v336_v5 }
  0xaf   :  { %416 = vst [vmem:[%s615_s1 + $0x10] sm:$0xf] %v415_v8  ;;  %v277_v12 = vpop.permute.xlu1 %276  ;;  %v271_v13 = vpop.permute.xlu0 %270 }
  0xb0   :  { %v421_v9 = vld [vmem:[#allocation3 + $0x1c] sm:$0xf]  ;;  %v357_v10 = vld [vmem:[#allocation2 + $0x58] sm:$0xf]  ;;  %278 = vst [vmem:[#allocation2 + $0x50] sm:$0xff] %v277_v12  ;;  %272 = vst [vmem:[#allocation2 + $0x60] sm:$0xff] %v271_v13 }
  0xb1   :  { %v350_v11 = vld [vmem:[#allocation2 + $0x18] sm:$0xf]  ;;  %422 = vst [vmem:[%s615_s1 + $0x1c] sm:$0xf] %v421_v9  ;;  %362 = vst [vmem:[#allocation3 + $0x2c] sm:$0xf] %v357_v10 }
  0xb2   :  { %v419_v14 = vld [vmem:[#allocation3 + $0x18] sm:$0xf]  ;;  %355 = vst [vmem:[#allocation3 + $0x28] sm:$0xf] %v350_v11 }
  0xb3   :  { %420 = vst [vmem:[%s615_s1 + $0x18] sm:$0xf] %v419_v14  ;;  %v371_v17 = vld [vmem:[#allocation2 + $0x8] sm:$0xf]  ;;  %v364_v18 = vld [vmem:[#allocation2] sm:$0xf] }
  0xb4   :  { %376 = vst [vmem:[#allocation3 + $0x34] sm:$0xf] %v371_v17  ;;  %369 = vst [vmem:[#allocation3 + $0x30] sm:$0xf] %v364_v18 }
  0xb5   :  { %v425_v15 = vld [vmem:[#allocation3 + $0x24] sm:$0xf]  ;;  %v423_v16 = vld [vmem:[#allocation3 + $0x20] sm:$0xf] }
  0xb6   :  { %426 = vst [vmem:[%s615_s1 + $0x24] sm:$0xf] %v425_v15  ;;  %424 = vst [vmem:[%s615_s1 + $0x20] sm:$0xf] %v423_v16 }
  0xb7   :  { %v385_v21 = vld [vmem:[#allocation2 + $0x50] sm:$0xf]  ;;  %v378_v22 = vld [vmem:[#allocation2 + $0x60] sm:$0xf] }
  0xb8   :  { %v429_v19 = vld [vmem:[#allocation3 + $0x2c] sm:$0xf]  ;;  %390 = vst [vmem:[#allocation3 + $0x3c] sm:$0xf] %v385_v21  ;;  %383 = vst [vmem:[#allocation3 + $0x38] sm:$0xf] %v378_v22 }
  0xb9   :  { %v427_v20 = vld [vmem:[#allocation3 + $0x28] sm:$0xf]  ;;  %430 = vst [vmem:[%s615_s1 + $0x2c] sm:$0xf] %v429_v19 }
  0xba   :  { %428 = vst [vmem:[%s615_s1 + $0x28] sm:$0xf] %v427_v20 }
  0xbb   :  { %v433_v23 = vld [vmem:[#allocation3 + $0x34] sm:$0xf]  ;;  %v431_v24 = vld [vmem:[#allocation3 + $0x30] sm:$0xf] }
  0xbc   :  { %434 = vst [vmem:[%s615_s1 + $0x34] sm:$0xf] %v433_v23  ;;  %432 = vst [vmem:[%s615_s1 + $0x30] sm:$0xf] %v431_v24 }
  0xbf   :  { %v437_v25 = vld [vmem:[#allocation3 + $0x3c] sm:$0xf]  ;;  %v435_v26 = vld [vmem:[#allocation3 + $0x38] sm:$0xf] }
  0xc0   :  { %438 = vst [vmem:[%s615_s1 + $0x3c] sm:$0xf] %v437_v25  ;;  %436 = vst [vmem:[%s615_s1 + $0x38] sm:$0xf] %v435_v26 }

// kernel: multi_wavelet_cross_forward.13
= control target key start
LH: loop header
LB: loop body
LE: loop exit
PB: predicated region body
PF: predicated region fallthrough
CT: control target
= control target key end

     0   :  { %vm28_vm0 = vcmask 130048   ;;  %s244_s0 = inlined_call_operand.vmem [shape: f32[32,16], index: 0, kind: input, shape index: {}]   ;;  %s245_s1 = inlined_call_operand.vmem [shape: f32[16,32], index: 1, kind: input, shape index: {}]   ;;  %s246_s2 = inlined_call_operand.vmem [shape: f32[1,32], index: 2, kind: input, shape index: {}]   ;;  %s247_s3 = inlined_call_operand.hbm [shape: f32[32,32], index: 3, kind: output, shape index: {}]  }
   0x1   :  { %v20_v0 = vld [vmem:[%s245_s1 + $0x8] sm:$0xff]  ;;  %v19_v1 = vld [vmem:[%s245_s1] sm:$0xff]  ;;  %v17_v3 = vld [vmem:[%s244_s0 + $0x10] sm:$0xff] }
   0x2   :  { %158 = vmatprep.subr.mxu0 %v20_v0  ;;  %168 = vmatprep.subr.mxu1 %v20_v0  ;;  %v15_v2 = vld [vmem:[%s244_s0] sm:$0xff] }
   0x3   :  { %159 = vmatpush3.msra.mxu0 %v20_v0  ;;  %170 = vmatpush3.msra.mxu1 %v20_v0 }
   0x4   :  { %8 = vsyncpa [#allocation3], 0  ;;  %160 = vmatprep.subr.mxu0 %v19_v1  ;;  %169 = vmatprep.subr.mxu1 %v19_v1  ;;  %v16_v4 = vld [vmem:[%s244_s0 + $0x8] sm:$0xff]  ;;  %v18_v5 = vld [vmem:[%s244_s0 + $0x18] sm:$0xff]  ;;  %s197_s25 = smov [#allocation2]   ;;  %vm126_vm1 = vcmask 261120  }
   0x5   :  { %161 = vmatpush3.msra.mxu0 %v19_v1  ;;  %171 = vmatpush3.msra.mxu1 %v19_v1  ;;  %v147_v6 = vld [vmem:[%s246_s2] ss:$0 sm:$0xff]  ;;  %s136_s26 = sshll.u32 %s197_s25, 4  ;;  %s137_s26 = int_to_ptr.vmem [resolvable:$true] %s136_s26 }
   0x6   :  { %162 = vmatprep.mubr.msk.f32.mxu0 %vm28_vm0, %v15_v2  ;;  %165 = vmatprep.mubr.msk.f32.mxu1 %vm28_vm0, %v17_v3  ;;  %s175_s0 = scalar_lea.vmem %s137_s26, 512  ;;  %p180_p1 = scmp.lt.s32.totalorder %s137_s26, %s137_s26 }
   0x7   :  { %163 = vmatmul.mubr.msk.f32.vlgmr.msra.gmra.mxu0 %vm28_vm0, %v16_v4  ;;  %166 = vmatmul.mubr.msk.f32.vlgmr.msra.gmra.mxu1 %vm28_vm0, %v18_v5  ;;  %p176_p0 = scmp.ne.s32.totalorder %s137_s26, %s175_s0  ;;  %p181_p2 = scmp.lt.s32.totalorder %s175_s0, %s175_s0 }
   0x9   :  { %p182_p3 = por %p181_p2, %p180_p1 }
   0xb   :  { %p183_p4 = pnand %p182_p3, %p176_p0 }
  0xc7   :  { %v164_v7 = vpop.f32.mrf.mxu0  ;;  %v167_v8 = vpop.f32.mrf.mxu1 }
  0xc8   :  { %v113_v9 = vadd.f32 %v164_v7, %v147_v6  ;;  %v123_v10 = vadd.f32 %v167_v8, %v147_v6 }
  0xc9   :  { %v107_v11 = vpop.f32.mrf.mxu0  ;;  %v117_v12 = vpop.f32.mrf.mxu1 }
  0xca   :  { %128 = vst.msk [vmem:[#allocation2 + $0x8] sm:$0xff] %vm126_vm1, %v113_v9  ;;  %130 = vst.msk [vmem:[#allocation2 + $0x18] sm:$0xff] %vm126_vm1, %v123_v10  ;;  %v108_v13 = vadd.f32 %v147_v6, %v107_v11  ;;  %v118_v14 = vadd.f32 %v147_v6, %v117_v12 }
  0xcc   :  { %127 = vst.msk [vmem:[#allocation2] sm:$0xff] %vm126_vm1, %v108_v13  ;;  %129 = vst.msk [vmem:[#allocation2 + $0x10] sm:$0xff] %vm126_vm1, %v118_v14 }
  0xcd   :  { %186 = shalt.err (!%p183_p4)
}
  0xce   :  { %s198_s2 = smov 128   ;;  %s199_s27 = smov 8  }
  0xcf   :  { %142 = dma.vmem_to_hbm [thread:$0]  %s137_s26, 512, %s247_s3, [#allocation3], %s198_s2, %s198_s2, %s199_s27  }
  0xd0   :  { %195 = dma.done.wait [#allocation3], 512  }
  0xd1   :  { %196 = vsyncadd [#allocation3], 4294966784 }
  0xd2   :  { %146 = vsyncpa [#allocation3], 1 }

// kernel: multi_wavelet_cross_forward.11
= control target key start
LH: loop header
LB: loop body
LE: loop exit
PB: predicated region body
PF: predicated region fallthrough
CT: control target
= control target key end

     0   :  { %v13519_v2 = vmov 0.0   ;;  %vm11836_vm0 = vmmov 0   ;;  %vm117_vm1 = vcmask 1043456   ;;  %vm113_vm2 = vcmask 31744   ;;  %s13513_s0 = inlined_call_operand.vmem [shape: f32[16,4,4], index: 0, kind: input, shape index: {}]   ;;  %s13514_s2 = inlined_call_operand.vmem [shape: f32[16,4,4], index: 2, kind: input, shape index: {}]   ;;  %s13515_s1 = inlined_call_operand.vmem [shape: f32[16,4,4], index: 1, kind: input, shape index: {}]   ;;  %s13516_s3 = inlined_call_operand.vmem [shape: f32[16,4,4], index: 3, kind: input, shape index: {}]   ;;  %s13517_s4 = inlined_call_operand.vmem [shape: f32[16,4,8], index: 4, kind: output, shape index: {}]  }
   0x1   :  { %v17_v0 = vld [vmem:[%s13513_s0] sm:$0xf]  ;;  %v19_v1 = vld [vmem:[%s13513_s0 + $0x8] sm:$0xf]  ;;  %11096 = vmatprep.subr.mxu0 %v13519_v2  ;;  %11098 = vmatprep.mubr.msk.f32.mxu0 %vm11836_vm0, %v13519_v2  ;;  %v18_v3 = vld [vmem:[%s13513_s0 + $0x4] sm:$0xf] }
   0x2   :  { %81 = vxpose.xlu0.b32.start.end [1/1] (short) (narrow) %v17_v0, 8  ;;  %299 = vxpose.xlu1.b32.start.end [1/1] (short) (narrow) %v19_v1, 8  ;;  %v20_v4 = vld [vmem:[%s13513_s0 + $0xc] sm:$0xf]  ;;  %v21_v5 = vld [vmem:[%s13513_s0 + $0x10] sm:$0xf] }
   0x3   :  { %11101 = vmatprep.subr.mxu1 %v13519_v2  ;;  %11103 = vmatprep.mubr.msk.f32.mxu1 %vm11836_vm0, %v13519_v2  ;;  %v22_v6 = vld [vmem:[%s13513_s0 + $0x14] sm:$0xf]  ;;  %v23_v7 = vld [vmem:[%s13513_s0 + $0x18] sm:$0xf]  ;;  %v24_v8 = vld [vmem:[%s13513_s0 + $0x1c] sm:$0xf] }
   0x4   :  { %v11896_v9 = vld [vmem:[%s13514_s2] sm:$0xf]  ;;  %v11903_v10 = vld [vmem:[%s13514_s2 + $0x4] sm:$0xf]  ;;  %v27_v13 = vld [vmem:[%s13513_s0 + $0x28] sm:$0xf] }
   0x5   :  { %11097 = vmatpush3.msk.msra.mxu0 %vm117_vm1, %v11896_v9  ;;  %v25_v11 = vld [vmem:[%s13513_s0 + $0x20] sm:$0xf]  ;;  %v26_v12 = vld [vmem:[%s13513_s0 + $0x24] sm:$0xf]  ;;  %11102 = vmatpush3.msk.msra.mxu1 %vm117_vm1, %v11903_v10  ;;  %v28_v14 = vld [vmem:[%s13513_s0 + $0x2c] sm:$0xf] }
   0x6   :  { %191 = vxpose.xlu0.b32.start.end [1/1] (short) (narrow) %v18_v3, 8  ;;  %407 = vxpose.xlu1.b32.start.end [1/1] (short) (narrow) %v20_v4, 8  ;;  %v29_v15 = vld [vmem:[%s13513_s0 + $0x30] sm:$0xf]  ;;  %v30_v16 = vld [vmem:[%s13513_s0 + $0x34] sm:$0xf] }
   0x7   :  { %11106 = vmatprep.subr.mxu0 %v13519_v2  ;;  %11111 = vmatprep.subr.mxu1 %v13519_v2  ;;  %v31_v17 = vld [vmem:[%s13513_s0 + $0x38] sm:$0xf]  ;;  %v32_v18 = vld [vmem:[%s13513_s0 + $0x3c] sm:$0xf]  ;;  %v33_v19 = vld [vmem:[%s13515_s1] sm:$0xf] }
   0x8   :  { %v34_v20 = vld [vmem:[%s13515_s1 + $0x4] sm:$0xf]  ;;  %v35_v21 = vld [vmem:[%s13515_s1 + $0x8] sm:$0xf]  ;;  %v36_v22 = vld [vmem:[%s13515_s1 + $0xc] sm:$0xf] }
   0x9   :  { %v37_v23 = vld [vmem:[%s13515_s1 + $0x10] sm:$0xf]  ;;  %v38_v24 = vld [vmem:[%s13515_s1 + $0x14] sm:$0xf]  ;;  %v39_v25 = vld [vmem:[%s13515_s1 + $0x18] sm:$0xf] }
   0xa   :  { %515 = vxpose.xlu0.b32.start.end [1/1] (short) (narrow) %v21_v5, 8  ;;  %623 = vxpose.xlu1.b32.start.end [1/1] (short) (narrow) %v22_v6, 8  ;;  %v40_v26 = vld [vmem:[%s13515_s1 + $0x1c] sm:$0xf]  ;;  %v41_v27 = vld [vmem:[%s13515_s1 + $0x20] sm:$0xf] }
   0xb   :  { %v42_v28 = vld [vmem:[%s13515_s1 + $0x24] sm:$0xf]  ;;  %v43_v29 = vld [vmem:[%s13515_s1 + $0x28] sm:$0xf]  ;;  %v44_v30 = vld [vmem:[%s13515_s1 + $0x2c] sm:$0xf] }
   0xc   :  { %v45_v31 = vld [vmem:[%s13515_s1 + $0x30] sm:$0xf]  ;;  %v46_v32 = vld [vmem:[%s13515_s1 + $0x34] sm:$0xf]  ;;  %v47_v33 = vld [vmem:[%s13515_s1 + $0x38] sm:$0xf] }
   0xd   :  { %v48_v34 = vld [vmem:[%s13515_s1 + $0x3c] sm:$0xf]  ;;  %v11984_v35 = vld [vmem:[%s13514_s2 + $0x8] sm:$0xf]  ;;  %v11999_v38 = vld [vmem:[%s13514_s2 + $0xc] sm:$0xf] }
   0xe   :  { %731 = vxpose.xlu0.b32.start.end [1/1] (short) (narrow) %v23_v7, 8  ;;  %839 = vxpose.xlu1.b32.start.end [1/1] (short) (narrow) %v24_v8, 8  ;;  %v12009_v41 = vld [vmem:[%s13514_s2 + $0x10] sm:$0xf]  ;;  %v12026_v42 = vld [vmem:[%s13514_s2 + $0x14] sm:$0xf] }
   0xf   :  { %v12037_v45 = vld [vmem:[%s13514_s2 + $0x18] sm:$0xf]  ;;  %v12054_v46 = vld [vmem:[%s13514_s2 + $0x1c] sm:$0xf]  ;;  %v12065_v49 = vld [vmem:[%s13514_s2 + $0x20] sm:$0xf] }
  0x10   :  { %v12082_v50 = vld [vmem:[%s13514_s2 + $0x24] sm:$0xf]  ;;  %v12093_v53 = vld [vmem:[%s13514_s2 + $0x28] sm:$0xf]  ;;  %v12110_v54 = vld [vmem:[%s13514_s2 + $0x2c] sm:$0xf] }
  0x11   :  { %v12121_v57 = vld [vmem:[%s13514_s2 + $0x30] sm:$0xf]  ;;  %v12138_v58 = vld [vmem:[%s13514_s2 + $0x34] sm:$0xf]  ;;  %v12149_v61 = vld [vmem:[%s13514_s2 + $0x38] sm:$0xf] }
  0x12   :  { %947 = vxpose.xlu0.b32.start.end [1/1] (short) (narrow) %v25_v11, 8  ;;  %1055 = vxpose.xlu1.b32.start.end [1/1] (short) (narrow) %v26_v12, 8  ;;  %v12166_v62 = vld [vmem:[%s13514_s2 + $0x3c] sm:$0xf]  ;;  %v12177_v1 = vld [vmem:[%s13516_s3] sm:$0xf] }
  0x13   :  { %v12194_v3 = vld [vmem:[%s13516_s3 + $0x4] sm:$0xf]  ;;  %v12205_v6 = vld [vmem:[%s13516_s3 + $0x8] sm:$0xf]  ;;  %v12222_v7 = vld [vmem:[%s13516_s3 + $0xc] sm:$0xf] }
  0x14   :  { %v12233_v12 = vld [vmem:[%s13516_s3 + $0x10] sm:$0xf]  ;;  %vm10563_vm3 = vcmask 60416  }
  0x16   :  { %1163 = vxpose.xlu0.b32.start.end [1/1] (short) (narrow) %v27_v13, 8  ;;  %1271 = vxpose.xlu1.b32.start.end [1/1] (short) (narrow) %v28_v14, 8  ;;  %v12250_v13 = vld [vmem:[%s13516_s3 + $0x14] sm:$0xf] }
  0x1a   :  { %1379 = vxpose.xlu0.b32.start.end [1/1] (short) (narrow) %v29_v15, 8  ;;  %1487 = vxpose.xlu1.b32.start.end [1/1] (short) (narrow) %v30_v16, 8  ;;  %v12261_v16 = vld [vmem:[%s13516_s3 + $0x18] sm:$0xf] }
  0x1e   :  { %1595 = vxpose.xlu0.b32.start.end [1/1] (short) (narrow) %v31_v17, 8  ;;  %1703 = vxpose.xlu1.b32.start.end [1/1] (short) (narrow) %v32_v18, 8  ;;  %v12278_v17 = vld [vmem:[%s13516_s3 + $0x1c] sm:$0xf] }
  0x22   :  { %1811 = vxpose.xlu0.b32.start.end [1/1] (short) (narrow) %v33_v19, 8  ;;  %1919 = vxpose.xlu1.b32.start.end [1/1] (short) (narrow) %v34_v20, 8  ;;  %v12289_v20 = vld [vmem:[%s13516_s3 + $0x20] sm:$0xf] }
  0x26   :  { %2027 = vxpose.xlu0.b32.start.end [1/1] (short) (narrow) %v35_v21, 8  ;;  %2135 = vxpose.xlu1.b32.start.end [1/1] (short) (narrow) %v36_v22, 8  ;;  %v12306_v21 = vld [vmem:[%s13516_s3 + $0x24] sm:$0xf] }
  0x2a   :  { %2243 = vxpose.xlu0.b32.start.end [1/1] (short) (narrow) %v37_v23, 8  ;;  %2351 = vxpose.xlu1.b32.start.end [1/1] (short) (narrow) %v38_v24, 8  ;;  %v12317_v24 = vld [vmem:[%s13516_s3 + $0x28] sm:$0xf] }
  0x2e   :  { %2459 = vxpose.xlu0.b32.start.end [1/1] (short) (narrow) %v39_v25, 8  ;;  %2567 = vxpose.xlu1.b32.start.end [1/1] (short) (narrow) %v40_v26, 8  ;;  %v12334_v25 = vld [vmem:[%s13516_s3 + $0x2c] sm:$0xf] }
  0x32   :  { %2675 = vxpose.xlu0.b32.start.end [1/1] (short) (narrow) %v41_v27, 8  ;;  %2783 = vxpose.xlu1.b32.start.end [1/1] (short) (narrow) %v42_v28, 8  ;;  %v12345_v28 = vld [vmem:[%s13516_s3 + $0x30] sm:$0xf] }
  0x36   :  { %2891 = vxpose.xlu0.b32.start.end [1/1] (short) (narrow) %v43_v29, 8  ;;  %2999 = vxpose.xlu1.b32.start.end [1/1] (short) (narrow) %v44_v30, 8  ;;  %v12362_v29 = vld [vmem:[%s13516_s3 + $0x34] sm:$0xf] }
  0x3a   :  { %3107 = vxpose.xlu0.b32.start.end [1/1] (short) (narrow) %v45_v31, 8  ;;  %3215 = vxpose.xlu1.b32.start.end [1/1] (short) (narrow) %v46_v32, 8  ;;  %v12373_v32 = vld [vmem:[%s13516_s3 + $0x38] sm:$0xf] }
  0x3e   :  { %3323 = vxpose.xlu0.b32.start.end [1/1] (short) (narrow) %v47_v33, 8  ;;  %3431 = vxpose.xlu1.b32.start.end [1/1] (short) (narrow) %v48_v34, 8  ;;  %v12390_v33 = vld [vmem:[%s13516_s3 + $0x3c] sm:$0xf] }
  0x3f   :  { %13523 = vst [vmem:[#allocation3_spill] sm:$0xff] %v12390_v33 }
  0x7e   :  { %v11986_v36 = vpop.trf.xlu0  ;;  %v11988_v37 = vpop.trf.xlu1 }
  0x7f   :  { %11099 = vmatmul.mubr.msk.f32.vlgmr.msra.gmra.mxu0 %vm113_vm2, %v11986_v36 }
  0x80   :  { %11107 = vmatpush3.msk.msra.mxu0 %vm117_vm1, %v11984_v35  ;;  %11108 = vmatprep.mubr.msk.f32.mxu0 %vm11836_vm0, %v13519_v2 }
  0x81   :  { %11116 = vmatprep.subr.mxu0 %v13519_v2 }
  0x82   :  { %v12002_v39 = vpop.trf.xlu0  ;;  %v12004_v40 = vpop.trf.xlu1 }
  0x83   :  { %11104 = vmatmul.mubr.msk.f32.vlgmr.msra.gmra.mxu1 %vm113_vm2, %v12002_v39  ;;  %11109 = vmatmul.mubr.msk.f32.vlgmr.msra.gmra.mxu0 %vm113_vm2, %v11988_v37 }
  0x84   :  { %11112 = vmatpush3.msk.msra.mxu1 %vm117_vm1, %v11999_v38  ;;  %11113 = vmatprep.mubr.msk.f32.mxu1 %vm11836_vm0, %v13519_v2 }
  0x85   :  { %11117 = vmatpush3.msk.msra.mxu0 %vm117_vm1, %v12009_v41  ;;  %11118 = vmatprep.mubr.msk.f32.mxu0 %vm11836_vm0, %v13519_v2 }
  0x86   :  { %v12028_v43 = vpop.trf.xlu0  ;;  %11121 = vmatprep.subr.mxu1 %v13519_v2  ;;  %11126 = vmatprep.subr.mxu0 %v13519_v2  ;;  %v12032_v44 = vpop.trf.xlu1 }
  0x87   :  { %11114 = vmatmul.mubr.msk.f32.vlgmr.msra.gmra.mxu1 %vm113_vm2, %v12004_v40  ;;  %11119 = vmatmul.mubr.msk.f32.vlgmr.msra.gmra.mxu0 %vm113_vm2, %v12028_v43 }
  0x88   :  { %11122 = vmatpush3.msk.msra.mxu1 %vm117_vm1, %v12026_v42  ;;  %11123 = vmatprep.mubr.msk.f32.mxu1 %vm11836_vm0, %v13519_v2 }
  0x89   :  { %11127 = vmatpush3.msk.msra.mxu0 %vm117_vm1, %v12037_v45  ;;  %11128 = vmatprep.mubr.msk.f32.mxu0 %vm11836_vm0, %v13519_v2 }
  0x8a   :  { %v12056_v47 = vpop.trf.xlu0  ;;  %11131 = vmatprep.subr.mxu1 %v13519_v2  ;;  %11136 = vmatprep.subr.mxu0 %v13519_v2  ;;  %v12060_v48 = vpop.trf.xlu1 }
  0x8b   :  { %11124 = vmatmul.mubr.msk.f32.vlgmr.msra.gmra.mxu1 %vm113_vm2, %v12032_v44  ;;  %11129 = vmatmul.mubr.msk.f32.vlgmr.msra.gmra.mxu0 %vm113_vm2, %v12056_v47 }
  0x8c   :  { %11132 = vmatpush3.msk.msra.mxu1 %vm117_vm1, %v12054_v46  ;;  %11133 = vmatprep.mubr.msk.f32.mxu1 %vm11836_vm0, %v13519_v2 }
  0x8d   :  { %11137 = vmatpush3.msk.msra.mxu0 %vm117_vm1, %v12065_v49  ;;  %11138 = vmatprep.mubr.msk.f32.mxu0 %vm11836_vm0, %v13519_v2 }
  0x8e   :  { %v12084_v51 = vpop.trf.xlu0  ;;  %11141 = vmatprep.subr.mxu1 %v13519_v2  ;;  %11146 = vmatprep.subr.mxu0 %v13519_v2  ;;  %v12088_v52 = vpop.trf.xlu1 }
  0x8f   :  { %11134 = vmatmul.mubr.msk.f32.vlgmr.msra.gmra.mxu1 %vm113_vm2, %v12060_v48  ;;  %11139 = vmatmul.mubr.msk.f32.vlgmr.msra.gmra.mxu0 %vm113_vm2, %v12084_v51 }
  0x90   :  { %11142 = vmatpush3.msk.msra.mxu1 %vm117_vm1, %v12082_v50  ;;  %11143 = vmatprep.mubr.msk.f32.mxu1 %vm11836_vm0, %v13519_v2 }
  0x91   :  { %11147 = vmatpush3.msk.msra.mxu0 %vm117_vm1, %v12093_v53  ;;  %11148 = vmatprep.mubr.msk.f32.mxu0 %vm11836_vm0, %v13519_v2 }
  0x92   :  { %v12112_v55 = vpop.trf.xlu0  ;;  %11151 = vmatprep.subr.mxu1 %v13519_v2  ;;  %11156 = vmatprep.subr.mxu0 %v13519_v2  ;;  %v12116_v56 = vpop.trf.xlu1 }
  0x93   :  { %11144 = vmatmul.mubr.msk.f32.vlgmr.msra.gmra.mxu1 %vm113_vm2, %v12088_v52  ;;  %11149 = vmatmul.mubr.msk.f32.vlgmr.msra.gmra.mxu0 %vm113_vm2, %v12112_v55 }
  0x94   :  { %11152 = vmatpush3.msk.msra.mxu1 %vm117_vm1, %v12110_v54  ;;  %11153 = vmatprep.mubr.msk.f32.mxu1 %vm11836_vm0, %v13519_v2 }
  0x95   :  { %11157 = vmatpush3.msk.msra.mxu0 %vm117_vm1, %v12121_v57  ;;  %11158 = vmatprep.mubr.msk.f32.mxu0 %vm11836_vm0, %v13519_v2 }
  0x96   :  { %v12140_v59 = vpop.trf.xlu0  ;;  %11161 = vmatprep.subr.mxu1 %v13519_v2  ;;  %11166 = vmatprep.subr.mxu0 %v13519_v2  ;;  %v12144_v60 = vpop.trf.xlu1 }
  0x97   :  { %11154 = vmatmul.mubr.msk.f32.vlgmr.msra.gmra.mxu1 %vm113_vm2, %v12116_v56  ;;  %11159 = vmatmul.mubr.msk.f32.vlgmr.msra.gmra.mxu0 %vm113_vm2, %v12140_v59 }
  0x98   :  { %11162 = vmatpush3.msk.msra.mxu1 %vm117_vm1, %v12138_v58  ;;  %11163 = vmatprep.mubr.msk.f32.mxu1 %vm11836_vm0, %v13519_v2 }
  0x99   :  { %11167 = vmatpush3.msk.msra.mxu0 %vm117_vm1, %v12149_v61  ;;  %11168 = vmatprep.mubr.msk.f32.mxu0 %vm11836_vm0, %v13519_v2 }
  0x9a   :  { %v12168_v63 = vpop.trf.xlu0  ;;  %11171 = vmatprep.subr.mxu1 %v13519_v2  ;;  %11176 = vmatprep.subr.mxu0 %v13519_v2  ;;  %v12172_v0 = vpop.trf.xlu1 }
  0x9b   :  { %13522 = vst [vmem:[#allocation2_spill] sm:$0xff] %v12172_v0  ;;  %11164 = vmatmul.mubr.msk.f32.vlgmr.msra.gmra.mxu1 %vm113_vm2, %v12144_v60  ;;  %11169 = vmatmul.mubr.msk.f32.vlgmr.msra.gmra.mxu0 %vm113_vm2, %v12168_v63 }
  0x9c   :  { %11172 = vmatpush3.msk.msra.mxu1 %vm117_vm1, %v12166_v62  ;;  %11173 = vmatprep.mubr.msk.f32.mxu1 %vm11836_vm0, %v13519_v2 }
  0x9d   :  { %11177 = vmatpush3.msk.msra.mxu0 %vm117_vm1, %v12177_v1  ;;  %11178 = vmatprep.mubr.msk.f32.mxu0 %vm11836_vm0, %v13519_v2 }
  0x9e   :  { %v12196_v4 = vpop.trf.xlu0  ;;  %11181 = vmatprep.subr.mxu1 %v13519_v2  ;;  %11186 = vmatprep.subr.mxu0 %v13519_v2  ;;  %v12200_v5 = vpop.trf.xlu1 }
  0x9f   :  { %11174 = vmatmul.mubr.msk.f32.vlgmr.msra.gmra.mxu1 %vm113_vm2, %v12172_v0  ;;  %11179 = vmatmul.mubr.msk.f32.vlgmr.msra.gmra.mxu0 %vm113_vm2, %v12196_v4 }
  0xa0   :  { %11182 = vmatpush3.msk.msra.mxu1 %vm117_vm1, %v12194_v3  ;;  %11183 = vmatprep.mubr.msk.f32.mxu1 %vm11836_vm0, %v13519_v2 }
  0xa1   :  { %11187 = vmatpush3.msk.msra.mxu0 %vm117_vm1, %v12205_v6  ;;  %11188 = vmatprep.mubr.msk.f32.mxu0 %vm11836_vm0, %v13519_v2 }
  0xa2   :  { %v12224_v8 = vpop.trf.xlu0  ;;  %11191 = vmatprep.subr.mxu1 %v13519_v2  ;;  %11196 = vmatprep.subr.mxu0 %v13519_v2  ;;  %v12228_v11 = vpop.trf.xlu1 }
  0xa3   :  { %11184 = vmatmul.mubr.msk.f32.vlgmr.msra.gmra.mxu1 %vm113_vm2, %v12200_v5  ;;  %11189 = vmatmul.mubr.msk.f32.vlgmr.msra.gmra.mxu0 %vm113_vm2, %v12224_v8 }
  0xa4   :  { %11192 = vmatpush3.msk.msra.mxu1 %vm117_vm1, %v12222_v7  ;;  %11193 = vmatprep.mubr.msk.f32.mxu1 %vm11836_vm0, %v13519_v2 }
  0xa5   :  { %11197 = vmatpush3.msk.msra.mxu0 %vm117_vm1, %v12233_v12  ;;  %11198 = vmatprep.mubr.msk.f32.mxu0 %vm11836_vm0, %v13519_v2 }
  0xa6   :  { %v12252_v14 = vpop.trf.xlu0  ;;  %11201 = vmatprep.subr.mxu1 %v13519_v2  ;;  %11206 = vmatprep.subr.mxu0 %v13519_v2  ;;  %v12256_v15 = vpop.trf.xlu1 }
  0xa7   :  { %11194 = vmatmul.mubr.msk.f32.vlgmr.msra.gmra.mxu1 %vm113_vm2, %v12228_v11  ;;  %11199 = vmatmul.mubr.msk.f32.vlgmr.msra.gmra.mxu0 %vm113_vm2, %v12252_v14 }
  0xa8   :  { %11202 = vmatpush3.msk.msra.mxu1 %vm117_vm1, %v12250_v13  ;;  %11203 = vmatprep.mubr.msk.f32.mxu1 %vm11836_vm0, %v13519_v2 }
  0xa9   :  { %11207 = vmatpush3.msk.msra.mxu0 %vm117_vm1, %v12261_v16  ;;  %11208 = vmatprep.mubr.msk.f32.mxu0 %vm11836_vm0, %v13519_v2 }
  0xaa   :  { %v12280_v18 = vpop.trf.xlu0  ;;  %11211 = vmatprep.subr.mxu1 %v13519_v2  ;;  %11216 = vmatprep.subr.mxu0 %v13519_v2  ;;  %v12284_v19 = vpop.trf.xlu1 }
  0xab   :  { %11204 = vmatmul.mubr.msk.f32.vlgmr.msra.gmra.mxu1 %vm113_vm2, %v12256_v15  ;;  %11209 = vmatmul.mubr.msk.f32.vlgmr.msra.gmra.mxu0 %vm113_vm2, %v12280_v18 }
  0xac   :  { %11212 = vmatpush3.msk.msra.mxu1 %vm117_vm1, %v12278_v17  ;;  %11213 = vmatprep.mubr.msk.f32.mxu1 %vm11836_vm0, %v13519_v2 }
  0xad   :  { %11217 = vmatpush3.msk.msra.mxu0 %vm117_vm1, %v12289_v20  ;;  %11218 = vmatprep.mubr.msk.f32.mxu0 %vm11836_vm0, %v13519_v2 }
  0xae   :  { %v12308_v22 = vpop.trf.xlu0  ;;  %11221 = vmatprep.subr.mxu1 %v13519_v2  ;;  %11226 = vmatprep.subr.mxu0 %v13519_v2  ;;  %v12312_v23 = vpop.trf.xlu1 }
  0xaf   :  { %11214 = vmatmul.mubr.msk.f32.vlgmr.msra.gmra.mxu1 %vm113_vm2, %v12284_v19  ;;  %11219 = vmatmul.mubr.msk.f32.vlgmr.msra.gmra.mxu0 %vm113_vm2, %v12308_v22 }
  0xb0   :  { %11222 = vmatpush3.msk.msra.mxu1 %vm117_vm1, %v12306_v21  ;;  %11223 = vmatprep.mubr.msk.f32.mxu1 %vm11836_vm0, %v13519_v2 }
  0xb1   :  { %11227 = vmatpush3.msk.msra.mxu0 %vm117_vm1, %v12317_v24  ;;  %11228 = vmatprep.mubr.msk.f32.mxu0 %vm11836_vm0, %v13519_v2 }
  0xb2   :  { %v12336_v26 = vpop.trf.xlu0  ;;  %11231 = vmatprep.subr.mxu1 %v13519_v2  ;;  %11236 = vmatprep.subr.mxu0 %v13519_v2  ;;  %v12340_v27 = vpop.trf.xlu1 }
  0xb3   :  { %11224 = vmatmul.mubr.msk.f32.vlgmr.msra.gmra.mxu1 %vm113_vm2, %v12312_v23  ;;  %11229 = vmatmul.mubr.msk.f32.vlgmr.msra.gmra.mxu0 %vm113_vm2, %v12336_v26 }
  0xb4   :  { %11232 = vmatpush3.msk.msra.mxu1 %vm117_vm1, %v12334_v25  ;;  %11233 = vmatprep.mubr.msk.f32.mxu1 %vm11836_vm0, %v13519_v2 }
  0xb5   :  { %11237 = vmatpush3.msk.msra.mxu0 %vm117_vm1, %v12345_v28  ;;  %11238 = vmatprep.mubr.msk.f32.mxu0 %vm11836_vm0, %v13519_v2 }
  0xb6   :  { %v12364_v30 = vpop.trf.xlu0  ;;  %11241 = vmatprep.subr.mxu1 %v13519_v2  ;;  %11246 = vmatprep.subr.mxu0 %v13519_v2  ;;  %v12368_v31 = vpop.trf.xlu1 }
  0xb7   :  { %11234 = vmatmul.mubr.msk.f32.vlgmr.msra.gmra.mxu1 %vm113_vm2, %v12340_v27  ;;  %11239 = vmatmul.mubr.msk.f32.vlgmr.msra.gmra.mxu0 %vm113_vm2, %v12364_v30 }
  0xb8   :  { %11242 = vmatpush3.msk.msra.mxu1 %vm117_vm1, %v12362_v29  ;;  %11243 = vmatprep.mubr.msk.f32.mxu1 %vm11836_vm0, %v13519_v2 }
  0xb9   :  { %11247 = vmatpush3.msk.msra.mxu0 %vm117_vm1, %v12373_v32  ;;  %11248 = vmatprep.mubr.msk.f32.mxu0 %vm11836_vm0, %v13519_v2 }
  0xba   :  { %v12392_v34 = vpop.trf.xlu0  ;;  %11251 = vmatprep.subr.mxu1 %v13519_v2  ;;  %11256 = vmatprep.subr.mxu0 %v13519_v2  ;;  %v12402_v0 = vpop.trf.xlu1 }
  0xbb   :  { %11244 = vmatmul.mubr.msk.f32.vlgmr.msra.gmra.mxu1 %vm113_vm2, %v12368_v31  ;;  %11249 = vmatmul.mubr.msk.f32.vlgmr.msra.gmra.mxu0 %vm113_vm2, %v12392_v34 }
  0xbc   :  { %11252 = vmatpush3.msk.msra.mxu1 %vm117_vm1, %v12390_v33  ;;  %11253 = vmatprep.mubr.msk.f32.mxu1 %vm11836_vm0, %v13519_v2 }
  0xbd   :  { %11257 = vmatpush3.msk.msra.mxu0 %vm117_vm1, %v11896_v9  ;;  %11258 = vmatprep.mubr.msk.f32.mxu0 %vm11836_vm0, %v13519_v2 }
  0xbe   :  { %11261 = vmatprep.subr.mxu1 %v13519_v2  ;;  %11266 = vmatprep.subr.mxu0 %v13519_v2 }
  0xbf   :  { %11254 = vmatmul.mubr.msk.f32.vlgmr.msra.gmra.mxu1 %vm113_vm2, %v12402_v0  ;;  %11259 = vmatmul.mubr.msk.f32.vlgmr.msra.gmra.mxu0 %vm113_vm2, %v12196_v4 }
  0xc0   :  { %11262 = vmatpush3.msk.msra.mxu1 %vm117_vm1, %v11903_v10  ;;  %11263 = vmatprep.mubr.msk.f32.mxu1 %vm11836_vm0, %v13519_v2 }
  0xc1   :  { %11267 = vmatpush3.msk.msra.mxu0 %vm117_vm1, %v11984_v35  ;;  %11268 = vmatprep.mubr.msk.f32.mxu0 %vm11836_vm0, %v13519_v2 }
  0xc2   :  { %11271 = vmatprep.subr.mxu1 %v13519_v2  ;;  %11276 = vmatprep.subr.mxu0 %v13519_v2 }
  0xc3   :  { %11264 = vmatmul.mubr.msk.f32.vlgmr.msra.gmra.mxu1 %vm113_vm2, %v12200_v5  ;;  %11269 = vmatmul.mubr.msk.f32.vlgmr.msra.gmra.mxu0 %vm113_vm2, %v12224_v8 }
  0xc4   :  { %11272 = vmatpush3.msk.msra.mxu1 %vm117_vm1, %v11999_v38  ;;  %11273 = vmatprep.mubr.msk.f32.mxu1 %vm11836_vm0, %v13519_v2 }
  0xc5   :  { %11277 = vmatpush3.msk.msra.mxu0 %vm117_vm1, %v12009_v41  ;;  %11278 = vmatprep.mubr.msk.f32.mxu0 %vm11836_vm0, %v13519_v2 }
  0xc6   :  { %11281 = vmatprep.subr.mxu1 %v13519_v2  ;;  %11286 = vmatprep.subr.mxu0 %v13519_v2 }
  0xc7   :  { %11274 = vmatmul.mubr.msk.f32.vlgmr.msra.gmra.mxu1 %vm113_vm2, %v12228_v11  ;;  %11279 = vmatmul.mubr.msk.f32.vlgmr.msra.gmra.mxu0 %vm113_vm2, %v12252_v14 }
  0xc8   :  { %11282 = vmatpush3.msk.msra.mxu1 %vm117_vm1, %v12026_v42  ;;  %11283 = vmatprep.mubr.msk.f32.mxu1 %vm11836_vm0, %v13519_v2 }
  0xc9   :  { %11287 = vmatpush3.msk.msra.mxu0 %vm117_vm1, %v12037_v45  ;;  %11288 = vmatprep.mubr.msk.f32.mxu0 %vm11836_vm0, %v13519_v2 }
  0xca   :  { %11291 = vmatprep.subr.mxu1 %v13519_v2  ;;  %11296 = vmatprep.subr.mxu0 %v13519_v2 }
  0xcb   :  { %11284 = vmatmul.mubr.msk.f32.vlgmr.msra.gmra.mxu1 %vm113_vm2, %v12256_v15  ;;  %11289 = vmatmul.mubr.msk.f32.vlgmr.msra.gmra.mxu0 %vm113_vm2, %v12280_v18 }
  0xcc   :  { %11292 = vmatpush3.msk.msra.mxu1 %vm117_vm1, %v12054_v46  ;;  %11293 = vmatprep.mubr.msk.f32.mxu1 %vm11836_vm0, %v13519_v2 }
  0xcd   :  { %11297 = vmatpush3.msk.msra.mxu0 %vm117_vm1, %v12065_v49  ;;  %11298 = vmatprep.mubr.msk.f32.mxu0 %vm11836_vm0, %v13519_v2 }
  0xce   :  { %11301 = vmatprep.subr.mxu1 %v13519_v2  ;;  %11306 = vmatprep.subr.mxu0 %v13519_v2 }
  0xcf   :  { %11294 = vmatmul.mubr.msk.f32.vlgmr.msra.gmra.mxu1 %vm113_vm2, %v12284_v19  ;;  %11299 = vmatmul.mubr.msk.f32.vlgmr.msra.gmra.mxu0 %vm113_vm2, %v12308_v22 }
  0xd0   :  { %11302 = vmatpush3.msk.msra.mxu1 %vm117_vm1, %v12082_v50  ;;  %11303 = vmatprep.mubr.msk.f32.mxu1 %vm11836_vm0, %v13519_v2 }
  0xd1   :  { %11307 = vmatpush3.msk.msra.mxu0 %vm117_vm1, %v12093_v53  ;;  %11308 = vmatprep.mubr.msk.f32.mxu0 %vm11836_vm0, %v13519_v2 }
  0xd2   :  { %11311 = vmatprep.subr.mxu1 %v13519_v2  ;;  %11316 = vmatprep.subr.mxu0 %v13519_v2 }
  0xd3   :  { %11304 = vmatmul.mubr.msk.f32.vlgmr.msra.gmra.mxu1 %vm113_vm2, %v12312_v23  ;;  %11309 = vmatmul.mubr.msk.f32.vlgmr.msra.gmra.mxu0 %vm113_vm2, %v12336_v26 }
  0xd4   :  { %11312 = vmatpush3.msk.msra.mxu1 %vm117_vm1, %v12110_v54  ;;  %11313 = vmatprep.mubr.msk.f32.mxu1 %vm11836_vm0, %v13519_v2 }
  0xd5   :  { %11317 = vmatpush3.msk.msra.mxu0 %vm117_vm1, %v12121_v57  ;;  %11318 = vmatprep.mubr.msk.f32.mxu0 %vm11836_vm0, %v13519_v2 }
  0xd6   :  { %11321 = vmatprep.subr.mxu1 %v13519_v2  ;;  %11326 = vmatprep.subr.mxu0 %v13519_v2 }
  0xd7   :  { %11314 = vmatmul.mubr.msk.f32.vlgmr.msra.gmra.mxu1 %vm113_vm2, %v12340_v27  ;;  %11319 = vmatmul.mubr.msk.f32.vlgmr.msra.gmra.mxu0 %vm113_vm2, %v12364_v30 }
  0xd8   :  { %11322 = vmatpush3.msk.msra.mxu1 %vm117_vm1, %v12138_v58  ;;  %11323 = vmatprep.mubr.msk.f32.mxu1 %vm11836_vm0, %v13519_v2 }
  0xd9   :  { %11327 = vmatpush3.msk.msra.mxu0 %vm117_vm1, %v12149_v61  ;;  %11328 = vmatprep.mubr.msk.f32.mxu0 %vm11836_vm0, %v13519_v2 }
  0xda   :  { %11331 = vmatprep.subr.mxu1 %v13519_v2  ;;  %11336 = vmatprep.subr.mxu0 %v13519_v2 }
  0xdb   :  { %11324 = vmatmul.mubr.msk.f32.vlgmr.msra.gmra.mxu1 %vm113_vm2, %v12368_v31  ;;  %11329 = vmatmul.mubr.msk.f32.vlgmr.msra.gmra.mxu0 %vm113_vm2, %v12392_v34 }
  0xdc   :  { %11332 = vmatpush3.msk.msra.mxu1 %vm117_vm1, %v12166_v62  ;;  %11333 = vmatprep.mubr.msk.f32.mxu1 %vm11836_vm0, %v13519_v2 }
  0xdd   :  { %11337 = vmatpush3.msk.msra.mxu0 %vm117_vm1, %v12177_v1  ;;  %11338 = vmatprep.mubr.msk.f32.mxu0 %vm11836_vm0, %v13519_v2 }
  0xde   :  { %11341 = vmatprep.subr.mxu1 %v13519_v2  ;;  %11346 = vmatprep.subr.mxu0 %v13519_v2 }
  0xdf   :  { %11334 = vmatmul.mubr.msk.f32.vlgmr.msra.gmra.mxu1 %vm113_vm2, %v12402_v0  ;;  %11339 = vmatmul.mubr.msk.f32.vlgmr.msra.gmra.mxu0 %vm113_vm2, %v11986_v36  ;;  %v13524_v36 = vld [vmem:[#allocation2_spill] sm:$0xff] }
  0xe0   :  { %11342 = vmatpush3.msk.msra.mxu1 %vm117_vm1, %v12194_v3  ;;  %11343 = vmatprep.mubr.msk.f32.mxu1 %vm11836_vm0, %v13519_v2 }
  0xe1   :  { %11347 = vmatpush3.msk.msra.mxu0 %vm117_vm1, %v12205_v6  ;;  %11348 = vmatprep.mubr.msk.f32.mxu0 %vm11836_vm0, %v13519_v2 }
  0xe2   :  { %11351 = vmatprep.subr.mxu1 %v13519_v2  ;;  %11356 = vmatprep.subr.mxu0 %v13519_v2 }
  0xe3   :  { %11344 = vmatmul.mubr.msk.f32.vlgmr.msra.gmra.mxu1 %vm113_vm2, %v12002_v39  ;;  %11349 = vmatmul.mubr.msk.f32.vlgmr.msra.gmra.mxu0 %vm113_vm2, %v11988_v37 }
  0xe4   :  { %11352 = vmatpush3.msk.msra.mxu1 %vm117_vm1, %v12222_v7  ;;  %11353 = vmatprep.mubr.msk.f32.mxu1 %vm11836_vm0, %v13519_v2 }
  0xe5   :  { %11357 = vmatpush3.msk.msra.mxu0 %vm117_vm1, %v12233_v12  ;;  %11358 = vmatprep.mubr.msk.f32.mxu0 %vm11836_vm0, %v13519_v2 }
  0xe6   :  { %11361 = vmatprep.subr.mxu1 %v13519_v2  ;;  %11366 = vmatprep.subr.mxu0 %v13519_v2 }
  0xe7   :  { %11354 = vmatmul.mubr.msk.f32.vlgmr.msra.gmra.mxu1 %vm113_vm2, %v12004_v40  ;;  %11359 = vmatmul.mubr.msk.f32.vlgmr.msra.gmra.mxu0 %vm113_vm2, %v12028_v43 }
  0xe8   :  { %11362 = vmatpush3.msk.msra.mxu1 %vm117_vm1, %v12250_v13  ;;  %11363 = vmatprep.mubr.msk.f32.mxu1 %vm11836_vm0, %v13519_v2 }
  0xe9   :  { %11367 = vmatpush3.msk.msra.mxu0 %vm117_vm1, %v12261_v16  ;;  %11368 = vmatprep.mubr.msk.f32.mxu0 %vm11836_vm0, %v13519_v2 }
  0xea   :  { %11371 = vmatprep.subr.mxu1 %v13519_v2  ;;  %11376 = vmatprep.subr.mxu0 %v13519_v2 }
  0xeb   :  { %11364 = vmatmul.mubr.msk.f32.vlgmr.msra.gmra.mxu1 %vm113_vm2, %v12032_v44  ;;  %11369 = vmatmul.mubr.msk.f32.vlgmr.msra.gmra.mxu0 %vm113_vm2, %v12056_v47 }
  0xec   :  { %11372 = vmatpush3.msk.msra.mxu1 %vm117_vm1, %v12278_v17  ;;  %11373 = vmatprep.mubr.msk.f32.mxu1 %vm11836_vm0, %v13519_v2 }
  0xed   :  { %11377 = vmatpush3.msk.msra.mxu0 %vm117_vm1, %v12289_v20  ;;  %11378 = vmatprep.mubr.msk.f32.mxu0 %vm11836_vm0, %v13519_v2 }
  0xee   :  { %11381 = vmatprep.subr.mxu1 %v13519_v2  ;;  %11386 = vmatprep.subr.mxu0 %v13519_v2 }
  0xef   :  { %11374 = vmatmul.mubr.msk.f32.vlgmr.msra.gmra.mxu1 %vm113_vm2, %v12060_v48  ;;  %11379 = vmatmul.mubr.msk.f32.vlgmr.msra.gmra.mxu0 %vm113_vm2, %v12084_v51 }
  0xf0   :  { %11382 = vmatpush3.msk.msra.mxu1 %vm117_vm1, %v12306_v21  ;;  %11383 = vmatprep.mubr.msk.f32.mxu1 %vm11836_vm0, %v13519_v2 }
  0xf1   :  { %11387 = vmatpush3.msk.msra.mxu0 %vm117_vm1, %v12317_v24  ;;  %11388 = vmatprep.mubr.msk.f32.mxu0 %vm11836_vm0, %v13519_v2 }
  0xf2   :  { %11391 = vmatprep.subr.mxu1 %v13519_v2  ;;  %11396 = vmatprep.subr.mxu0 %v13519_v2 }
  0xf3   :  { %11384 = vmatmul.mubr.msk.f32.vlgmr.msra.gmra.mxu1 %vm113_vm2, %v12088_v52  ;;  %11389 = vmatmul.mubr.msk.f32.vlgmr.msra.gmra.mxu0 %vm113_vm2, %v12112_v55 }
  0xf4   :  { %11392 = vmatpush3.msk.msra.mxu1 %vm117_vm1, %v12334_v25  ;;  %11393 = vmatprep.mubr.msk.f32.mxu1 %vm11836_vm0, %v13519_v2 }
  0xf5   :  { %11397 = vmatpush3.msk.msra.mxu0 %vm117_vm1, %v12345_v28  ;;  %11398 = vmatprep.mubr.msk.f32.mxu0 %vm11836_vm0, %v13519_v2 }
  0xf6   :  { %11401 = vmatprep.subr.mxu1 %v13519_v2  ;;  %11406 = vmatprep.subr.mxu0 %v13519_v2 }
  0xf7   :  { %11394 = vmatmul.mubr.msk.f32.vlgmr.msra.gmra.mxu1 %vm113_vm2, %v12116_v56  ;;  %11399 = vmatmul.mubr.msk.f32.vlgmr.msra.gmra.mxu0 %vm113_vm2, %v12140_v59 }
  0xf8   :  { %11402 = vmatpush3.msk.msra.mxu1 %vm117_vm1, %v12362_v29  ;;  %11403 = vmatprep.mubr.msk.f32.mxu1 %vm11836_vm0, %v13519_v2 }
  0xf9   :  { %11407 = vmatpush3.msk.msra.mxu0 %vm117_vm1, %v12373_v32  ;;  %11408 = vmatprep.mubr.msk.f32.mxu0 %vm11836_vm0, %v13519_v2 }
  0xfa   :  { %11411 = vmatprep.subr.mxu1 %v13519_v2  ;;  %11416 = vmatprep.subr.mxu0 %v13519_v2 }
  0xfb   :  { %11404 = vmatmul.mubr.msk.f32.vlgmr.msra.gmra.mxu1 %vm113_vm2, %v12144_v60  ;;  %11409 = vmatmul.mubr.msk.f32.vlgmr.msra.gmra.mxu0 %vm113_vm2, %v12168_v63 }
  0xfc   :  { %11412 = vmatpush3.msk.msra.mxu1 %vm117_vm1, %v12390_v33  ;;  %11413 = vmatprep.mubr.msk.f32.mxu1 %vm11836_vm0, %v13519_v2 }
  0xfd   :  { %11418 = vmatprep.mubr.msk.f32.mxu0 %vm11836_vm0, %v13519_v2  ;;  %11421 = vmatprep.subr.mxu1 %v13519_v2 }
  0xff   :  { %11414 = vmatmul.mubr.msk.f32.vlgmr.msra.gmra.mxu1 %vm113_vm2, %v13524_v36 }
 0x100   :  { %11423 = vmatprep.mubr.msk.f32.mxu1 %vm11836_vm0, %v13519_v2 }
 0x13f   :  { %v187_v37 = vpop.f32.mrf.mxu0 }
 0x141   :  { %v11100_v39 = vpop.f32.mrf.mxu0 }
 0x143   :  { %v295_v40 = vpop.f32.mrf.mxu1  ;;  %v403_v43 = vpop.f32.mrf.mxu0 }
 0x145   :  { %v11105_v44 = vpop.f32.mrf.mxu1  ;;  %v11110_v47 = vpop.f32.mrf.mxu0 }
 0x147   :  { %v511_v48 = vpop.f32.mrf.mxu1  ;;  %v619_v51 = vpop.f32.mrf.mxu0 }
 0x149   :  { %v11115_v52 = vpop.f32.mrf.mxu1  ;;  %v11120_v55 = vpop.f32.mrf.mxu0 }
 0x14b   :  { %v727_v56 = vpop.f32.mrf.mxu1  ;;  %v835_v59 = vpop.f32.mrf.mxu0 }
 0x14d   :  { %v11125_v60 = vpop.f32.mrf.mxu1  ;;  %v11130_v63 = vpop.f32.mrf.mxu0 }
 0x14f   :  { %v943_v0 = vpop.f32.mrf.mxu1  ;;  %v1051_v4 = vpop.f32.mrf.mxu0 }
 0x151   :  { %v11135_v5 = vpop.f32.mrf.mxu1  ;;  %v11140_v8 = vpop.f32.mrf.mxu0 }
 0x153   :  { %v12637_v11 = vpop.f32.mrf.mxu1  ;;  %v12639_v14 = vpop.f32.mrf.mxu0 }
 0x155   :  { %v11145_v15 = vpop.f32.mrf.mxu1  ;;  %v11150_v18 = vpop.f32.mrf.mxu0 }
 0x157   :  { %v12641_v19 = vpop.f32.mrf.mxu1  ;;  %v12643_v22 = vpop.f32.mrf.mxu0 }
 0x159   :  { %v11155_v23 = vpop.f32.mrf.mxu1  ;;  %v11160_v26 = vpop.f32.mrf.mxu0 }
 0x15b   :  { %v12645_v27 = vpop.f32.mrf.mxu1  ;;  %v12647_v30 = vpop.f32.mrf.mxu0 }
 0x15d   :  { %v11165_v31 = vpop.f32.mrf.mxu1  ;;  %v11170_v34 = vpop.f32.mrf.mxu0 }
 0x15f   :  { %v12649_v36 = vpop.f32.mrf.mxu1  ;;  %v1915_v39 = vpop.f32.mrf.mxu0 }
 0x160   :  { %v4659_v44 = vsub.f32 %v187_v37, %v1915_v39 }
 0x161   :  { %v11175_v47 = vpop.f32.mrf.mxu1  ;;  %v11180_v52 = vpop.f32.mrf.mxu0 }
 0x162   :  { %11739 = vtanh.f32 %v4659_v44 }
 0x163   :  { %v2023_v55 = vpop.f32.mrf.mxu1  ;;  %v2131_v60 = vpop.f32.mrf.mxu0 }
 0x164   :  { %v4660_v63 = vsub.f32 %v295_v40, %v2023_v55  ;;  %v4661_v5 = vsub.f32 %v403_v43, %v2131_v60 }
 0x165   :  { %v11185_v8 = vpop.f32.mrf.mxu1  ;;  %v11190_v15 = vpop.f32.mrf.mxu0 }
 0x166   :  { %11741 = vtanh.f32 %v4660_v63 }
 0x167   :  { %11743 = vtanh.f32 %v4661_v5  ;;  %v2239_v18 = vpop.f32.mrf.mxu1  ;;  %v2347_v23 = vpop.f32.mrf.mxu0 }
 0x168   :  { %v4662_v26 = vsub.f32 %v511_v48, %v2239_v18  ;;  %v4663_v31 = vsub.f32 %v619_v51, %v2347_v23  ;;  %v13525_v51 = vmov 0.0  }
 0x169   :  { %v11195_v34 = vpop.f32.mrf.mxu1  ;;  %v11200_v2 = vpop.f32.mrf.mxu0 }
 0x16a   :  { %11745 = vtanh.f32 %v4662_v26 }
 0x16b   :  { %11747 = vtanh.f32 %v4663_v31  ;;  %v2455_v37 = vpop.f32.mrf.mxu1  ;;  %v2563_v39 = vpop.f32.mrf.mxu0 }
 0x16c   :  { %v4664_v47 = vsub.f32 %v727_v56, %v2455_v37  ;;  %v4665_v44 = vsub.f32 %v835_v59, %v2563_v39 }
 0x16d   :  { %v11205_v52 = vpop.f32.mrf.mxu1  ;;  %v11210_v33 = vpop.f32.mrf.mxu0 }
 0x16e   :  { %11749 = vtanh.f32 %v4664_v47 }
 0x16f   :  { %v12651_v40 = vpop.eup %11739  ;;  %11751 = vtanh.f32 %v4665_v44  ;;  %v2671_v43 = vpop.f32.mrf.mxu1 }
 0x170   :  { %v2779_v55 = vpop.f32.mrf.mxu0  ;;  %v4666_v60 = vsub.f32 %v943_v0, %v2671_v43  ;;  %11417 = vmatpush3.xpose.msk.msra.mxu0 %vm113_vm2, %v12651_v40 }
 0x171   :  { %v4667_v63 = vsub.f32 %v1051_v4, %v2779_v55  ;;  %v11215_v2 = vpop.f32.mrf.mxu1  ;;  %11426 = vmatprep.subr.mxu0 %v13525_v51 }
 0x172   :  { %v11220_v48 = vpop.f32.mrf.mxu0  ;;  %11753 = vtanh.f32 %v4666_v60 }
 0x173   :  { %v12656_v56 = vpop.eup %11741  ;;  %11755 = vtanh.f32 %v4667_v63  ;;  %v2887_v33 = vpop.f32.mrf.mxu1  ;;  %11419 = vmatmul.mubr.msk.f32.vlgmr.msra.gmra.mxu0 %vm113_vm2, %v11896_v9 }
 0x174   :  { %v2995_v59 = vpop.f32.mrf.mxu0  ;;  %v12660_v5 = vpop.eup %11743  ;;  %v4668_v0 = vsub.f32 %v12637_v11, %v2887_v33  ;;  %11422 = vmatpush3.xpose.msk.msra.mxu1 %vm113_vm2, %v12656_v56  ;;  %11428 = vmatprep.mubr.msk.f32.mxu0 %vm11836_vm0, %v13525_v51 }
 0x175   :  { %v4669_v4 = vsub.f32 %v12639_v14, %v2995_v59  ;;  %11427 = vmatpush3.xpose.msk.msra.mxu0 %vm113_vm2, %v12660_v5  ;;  %v11225_v8 = vpop.f32.mrf.mxu1  ;;  %11431 = vmatprep.subr.mxu1 %v13525_v51 }
 0x176   :  { %v11230_v15 = vpop.f32.mrf.mxu0  ;;  %11757 = vtanh.f32 %v4668_v0  ;;  %11436 = vmatprep.subr.mxu0 %v13525_v51 }
 0x177   :  { %v12672_v9 = vpop.eup %11745  ;;  %11759 = vtanh.f32 %v4669_v4  ;;  %v3103_v11 = vpop.f32.mrf.mxu1  ;;  %11424 = vmatmul.mubr.msk.f32.vlgmr.msra.gmra.mxu1 %vm113_vm2, %v11903_v10 }
 0x178   :  { %v3211_v14 = vpop.f32.mrf.mxu0  ;;  %v12676_v18 = vpop.eup %11747  ;;  %v4670_v23 = vsub.f32 %v12641_v19, %v3103_v11  ;;  %11429 = vmatmul.mubr.msk.f32.vlgmr.msra.gmra.mxu0 %vm113_vm2, %v11984_v35  ;;  %11432 = vmatpush3.xpose.msk.msra.mxu1 %vm113_vm2, %v12672_v9 }
 0x179   :  { %v4671_v26 = vsub.f32 %v12643_v22, %v3211_v14  ;;  %11437 = vmatpush3.xpose.msk.msra.mxu0 %vm113_vm2, %v12676_v18  ;;  %v11235_v31 = vpop.f32.mrf.mxu1  ;;  %11433 = vmatprep.mubr.msk.f32.mxu1 %vm11836_vm0, %v13525_v51 }
 0x17a   :  { %v11240_v34 = vpop.f32.mrf.mxu0  ;;  %11761 = vtanh.f32 %v4670_v23  ;;  %11438 = vmatprep.mubr.msk.f32.mxu0 %vm11836_vm0, %v13525_v51  ;;  %11441 = vmatprep.subr.mxu1 %v13525_v51 }
 0x17b   :  { %v12691_v10 = vpop.eup %11749  ;;  %11763 = vtanh.f32 %v4671_v26  ;;  %v3319_v35 = vpop.f32.mrf.mxu1  ;;  %11446 = vmatprep.subr.mxu0 %v13525_v51  ;;  %11434 = vmatmul.mubr.msk.f32.vlgmr.msra.gmra.mxu1 %vm113_vm2, %v11999_v38 }
 0x17c   :  { %v3427_v19 = vpop.f32.mrf.mxu0  ;;  %v12696_v22 = vpop.eup %11751  ;;  %v4672_v37 = vsub.f32 %v12645_v27, %v3319_v35  ;;  %11439 = vmatmul.mubr.msk.f32.vlgmr.msra.gmra.mxu0 %vm113_vm2, %v12009_v41  ;;  %11442 = vmatpush3.xpose.msk.msra.mxu1 %vm113_vm2, %v12691_v10 }
 0x17d   :  { %v4673_v39 = vsub.f32 %v12647_v30, %v3427_v19  ;;  %11447 = vmatpush3.xpose.msk.msra.mxu0 %vm113_vm2, %v12696_v22  ;;  %v11245_v47 = vpop.f32.mrf.mxu1  ;;  %11443 = vmatprep.mubr.msk.f32.mxu1 %vm11836_vm0, %v13525_v51 }
 0x17e   :  { %v11250_v44 = vpop.f32.mrf.mxu0  ;;  %11765 = vtanh.f32 %v4672_v37  ;;  %11448 = vmatprep.mubr.msk.f32.mxu0 %vm11836_vm0, %v13525_v51  ;;  %11451 = vmatprep.subr.mxu1 %v13525_v51 }
 0x17f   :  { %v12711_v38 = vpop.eup %11753  ;;  %11767 = vtanh.f32 %v4673_v39  ;;  %v3535_v41 = vpop.f32.mrf.mxu1  ;;  %11456 = vmatprep.subr.mxu0 %v13525_v51  ;;  %11444 = vmatmul.mubr.msk.f32.vlgmr.msra.gmra.mxu1 %vm113_vm2, %v12026_v42 }
 0x180   :  { %v12713_v27 = vpop.f32.mrf.mxu0  ;;  %v12718_v30 = vpop.eup %11755  ;;  %v4674_v52 = vsub.f32 %v12649_v36, %v3535_v41  ;;  %11449 = vmatmul.mubr.msk.f32.vlgmr.msra.gmra.mxu0 %vm113_vm2, %v12037_v45  ;;  %11452 = vmatpush3.xpose.msk.msra.mxu1 %vm113_vm2, %v12711_v38 }
 0x181   :  { %11457 = vmatpush3.xpose.msk.msra.mxu0 %vm113_vm2, %v12718_v30  ;;  %v11255_v43 = vpop.f32.mrf.mxu1  ;;  %11453 = vmatprep.mubr.msk.f32.mxu1 %vm11836_vm0, %v13525_v51 }
 0x182   :  { %v11260_v55 = vpop.f32.mrf.mxu0  ;;  %11769 = vtanh.f32 %v4674_v52  ;;  %11458 = vmatprep.mubr.msk.f32.mxu0 %vm11836_vm0, %v13525_v51  ;;  %11461 = vmatprep.subr.mxu1 %v13525_v51 }
 0x183   :  { %v12732_v42 = vpop.eup %11757  ;;  %v12734_v45 = vpop.f32.mrf.mxu1  ;;  %11466 = vmatprep.subr.mxu0 %v13525_v51  ;;  %11454 = vmatmul.mubr.msk.f32.vlgmr.msra.gmra.mxu1 %vm113_vm2, %v12054_v46 }
 0x184   :  { %v12736_v36 = vpop.f32.mrf.mxu0  ;;  %v12741_v60 = vpop.eup %11759  ;;  %11459 = vmatmul.mubr.msk.f32.vlgmr.msra.gmra.mxu0 %vm113_vm2, %v12065_v49  ;;  %11462 = vmatpush3.xpose.msk.msra.mxu1 %vm113_vm2, %v12732_v42 }
 0x185   :  { %11467 = vmatpush3.xpose.msk.msra.mxu0 %vm113_vm2, %v12741_v60  ;;  %v11265_v63 = vpop.f32.mrf.mxu1  ;;  %11463 = vmatprep.mubr.msk.f32.mxu1 %vm11836_vm0, %v13525_v51 }
 0x186   :  { %v11270_v2 = vpop.f32.mrf.mxu0  ;;  %11468 = vmatprep.mubr.msk.f32.mxu0 %vm11836_vm0, %v13525_v51  ;;  %11471 = vmatprep.subr.mxu1 %v13525_v51 }
 0x187   :  { %v12754_v46 = vpop.eup %11761  ;;  %v12756_v48 = vpop.f32.mrf.mxu1  ;;  %11476 = vmatprep.subr.mxu0 %v13525_v51  ;;  %11464 = vmatmul.mubr.msk.f32.vlgmr.msra.gmra.mxu1 %vm113_vm2, %v12082_v50 }
 0x188   :  { %v12758_v49 = vpop.f32.mrf.mxu0  ;;  %v12763_v33 = vpop.eup %11763  ;;  %11469 = vmatmul.mubr.msk.f32.vlgmr.msra.gmra.mxu0 %vm113_vm2, %v12093_v53  ;;  %11472 = vmatpush3.xpose.msk.msra.mxu1 %vm113_vm2, %v12754_v46 }
 0x189   :  { %11477 = vmatpush3.xpose.msk.msra.mxu0 %vm113_vm2, %v12763_v33  ;;  %v11275_v59 = vpop.f32.mrf.mxu1  ;;  %11473 = vmatprep.mubr.msk.f32.mxu1 %vm11836_vm0, %v13525_v51 }
 0x18a   :  { %v11280_v0 = vpop.f32.mrf.mxu0  ;;  %11478 = vmatprep.mubr.msk.f32.mxu0 %vm11836_vm0, %v13525_v51  ;;  %11481 = vmatprep.subr.mxu1 %v13525_v51 }
 0x18b   :  { %v12776_v50 = vpop.eup %11765  ;;  %v12778_v4 = vpop.f32.mrf.mxu1  ;;  %11486 = vmatprep.subr.mxu0 %v13525_v51  ;;  %11474 = vmatmul.mubr.msk.f32.vlgmr.msra.gmra.mxu1 %vm113_vm2, %v12110_v54 }
 0x18c   :  { %v12780_v53 = vpop.f32.mrf.mxu0  ;;  %v12785_v8 = vpop.eup %11767  ;;  %11479 = vmatmul.mubr.msk.f32.vlgmr.msra.gmra.mxu0 %vm113_vm2, %v12121_v57  ;;  %11482 = vmatpush3.xpose.msk.msra.mxu1 %vm113_vm2, %v12776_v50 }
 0x18d   :  { %11487 = vmatpush3.xpose.msk.msra.mxu0 %vm113_vm2, %v12785_v8  ;;  %v11285_v15 = vpop.f32.mrf.mxu1  ;;  %11483 = vmatprep.mubr.msk.f32.mxu1 %vm11836_vm0, %v13525_v51 }
 0x18e   :  { %v11290_v11 = vpop.f32.mrf.mxu0  ;;  %11491 = vmatprep.subr.mxu1 %v13525_v51  ;;  %11488 = vmatprep.mubr.msk.f32.mxu0 %vm11836_vm0, %v13525_v51 }
 0x18f   :  { %v12798_v54 = vpop.eup %11769  ;;  %v4095_v14 = vpop.f32.mrf.mxu1  ;;  %11484 = vmatmul.mubr.msk.f32.vlgmr.msra.gmra.mxu1 %vm113_vm2, %v12138_v58  ;;  %11496 = vmatprep.subr.mxu0 %v13525_v51 }
 0x190   :  { %v4165_v57 = vpop.f32.mrf.mxu0  ;;  %11492 = vmatpush3.xpose.msk.msra.mxu1 %vm113_vm2, %v12798_v54  ;;  %11489 = vmatmul.mubr.msk.f32.vlgmr.msra.gmra.mxu0 %vm113_vm2, %v12149_v61 }
 0x191   :  { %v11295_v23 = vpop.f32.mrf.mxu1  ;;  %11493 = vmatprep.mubr.msk.f32.mxu1 %vm11836_vm0, %v13525_v51  ;;  %11498 = vmatprep.mubr.msk.f32.mxu0 %vm11836_vm0, %v13525_v51 }
 0x192   :  { %v11300_v26 = vpop.f32.mrf.mxu0  ;;  %11501 = vmatprep.subr.mxu1 %v13525_v51 }
 0x193   :  { %v4235_v31 = vpop.f32.mrf.mxu1  ;;  %11494 = vmatmul.mubr.msk.f32.vlgmr.msra.gmra.mxu1 %vm113_vm2, %v12166_v62 }
 0x194   :  { %v4305_v58 = vpop.f32.mrf.mxu0  ;;  %11503 = vmatprep.mubr.msk.f32.mxu1 %vm11836_vm0, %v13525_v51 }
 0x195   :  { %v11305_v34 = vpop.f32.mrf.mxu1 }
 0x196   :  { %v11310_v61 = vpop.f32.mrf.mxu0 }
 0x197   :  { %v12816_v35 = vpop.f32.mrf.mxu1 }
 0x198   :  { %v12818_v19 = vpop.f32.mrf.mxu0 }
 0x199   :  { %v11315_v37 = vpop.f32.mrf.mxu1 }
 0x19a   :  { %v11320_v39 = vpop.f32.mrf.mxu0 }
 0x19b   :  { %v12820_v47 = vpop.f32.mrf.mxu1 }
 0x19c   :  { %v12822_v44 = vpop.f32.mrf.mxu0 }
 0x19d   :  { %v11325_v41 = vpop.f32.mrf.mxu1 }
 0x19e   :  { %v11330_v52 = vpop.f32.mrf.mxu0 }
 0x19f   :  { %v12824_v43 = vpop.f32.mrf.mxu1 }
 0x1a0   :  { %v4757_v62 = vpop.f32.mrf.mxu0 }
 0x1a1   :  { %v4758_v55 = vadd.f32 %v4757_v62, %v12713_v27  ;;  %v11335_v63 = vpop.f32.mrf.mxu1 }
 0x1a2   :  { %v11340_v2 = vpop.f32.mrf.mxu0 }
 0x1a3   :  { %11771 = vtanh.f32 %v4758_v55  ;;  %v4827_v59 = vpop.f32.mrf.mxu1 }
 0x1a4   :  { %v4897_v0 = vpop.f32.mrf.mxu0  ;;  %v4828_v15 = vadd.f32 %v4827_v59, %v12734_v45 }
 0x1a5   :  { %v4898_v11 = vadd.f32 %v4897_v0, %v12736_v36  ;;  %v11345_v23 = vpop.f32.mrf.mxu1 }
 0x1a6   :  { %v11350_v26 = vpop.f32.mrf.mxu0  ;;  %11773 = vtanh.f32 %v4828_v15 }
 0x1a7   :  { %11775 = vtanh.f32 %v4898_v11  ;;  %v4967_v34 = vpop.f32.mrf.mxu1 }
 0x1a8   :  { %v5037_v61 = vpop.f32.mrf.mxu0  ;;  %v4968_v37 = vadd.f32 %v4967_v34, %v12756_v48 }
 0x1a9   :  { %v5038_v39 = vadd.f32 %v5037_v61, %v12758_v49  ;;  %v11355_v27 = vpop.f32.mrf.mxu1 }
 0x1aa   :  { %v11360_v41 = vpop.f32.mrf.mxu0  ;;  %11777 = vtanh.f32 %v4968_v37 }
 0x1ab   :  { %11779 = vtanh.f32 %v5038_v39  ;;  %v5107_v52 = vpop.f32.mrf.mxu1 }
 0x1ac   :  { %v5177_v62 = vpop.f32.mrf.mxu0  ;;  %v5108_v45 = vadd.f32 %v5107_v52, %v12778_v4 }
 0x1ad   :  { %v5178_v36 = vadd.f32 %v5177_v62, %v12780_v53  ;;  %v11365_v55 = vpop.f32.mrf.mxu1 }
 0x1ae   :  { %v11370_v63 = vpop.f32.mrf.mxu0  ;;  %11781 = vtanh.f32 %v5108_v45 }
 0x1af   :  { %11783 = vtanh.f32 %v5178_v36  ;;  %v5247_v59 = vpop.f32.mrf.mxu1 }
 0x1b0   :  { %v12833_v2 = vpop.eup %11771  ;;  %v5317_v48 = vpop.f32.mrf.mxu0  ;;  %v5248_v0 = vadd.f32 %v5247_v59, %v4095_v14  ;;  %v11807_v59 = vld [vmem:[%s13514_s2 + $0x10] sm:$0xf] }
 0x1b1   :  { %v5318_v49 = vadd.f32 %v5317_v48, %v4165_v57  ;;  %11497 = vmatpush3.xpose.msk.msra.mxu0 %vm113_vm2, %v12833_v2  ;;  %v11375_v15 = vpop.f32.mrf.mxu1  ;;  %v11808_v48 = vld [vmem:[%s13514_s2 + $0x14] sm:$0xf] }
 0x1b2   :  { %v11380_v11 = vpop.f32.mrf.mxu0  ;;  %11506 = vmatprep.subr.mxu0 %v13525_v51  ;;  %11785 = vtanh.f32 %v5248_v0  ;;  %v11809_v0 = vld [vmem:[%s13514_s2 + $0x18] sm:$0xf]  ;;  %v11811_v15 = vld [vmem:[%s13514_s2 + $0x20] sm:$0xf] }
 0x1b3   :  { %v12838_v4 = vpop.eup %11773  ;;  %11787 = vtanh.f32 %v5318_v49  ;;  %v5387_v53 = vpop.f32.mrf.mxu1  ;;  %v11810_v49 = vld [vmem:[%s13514_s2 + $0x1c] sm:$0xf]  ;;  %v11812_v11 = vld [vmem:[%s13514_s2 + $0x24] sm:$0xf] }
 0x1b4   :  { %v5457_v23 = vpop.f32.mrf.mxu0  ;;  %11499 = vmatmul.mubr.msk.f32.vlgmr.msra.gmra.mxu0 %vm113_vm2, %v12177_v1  ;;  %v12842_v26 = vpop.eup %11775  ;;  %v5388_v14 = vadd.f32 %v5387_v53, %v4235_v31  ;;  %11502 = vmatpush3.xpose.msk.msra.mxu1 %vm113_vm2, %v12838_v4  ;;  %v11814_v53 = vld [vmem:[%s13514_s2 + $0x2c] sm:$0xf] }
 0x1b5   :  { %v5458_v57 = vadd.f32 %v5457_v23, %v4305_v58  ;;  %11508 = vmatprep.mubr.msk.f32.mxu0 %vm11836_vm0, %v13525_v51  ;;  %11507 = vmatpush3.xpose.msk.msra.mxu0 %vm113_vm2, %v12842_v26  ;;  %v11385_v34 = vpop.f32.mrf.mxu1  ;;  %v11815_v23 = vld [vmem:[%s13514_s2 + $0x30] sm:$0xf] }
 0x1b6   :  { %v11390_v61 = vpop.f32.mrf.mxu0  ;;  %11511 = vmatprep.subr.mxu1 %v13525_v51  ;;  %11789 = vtanh.f32 %v5388_v14  ;;  %11516 = vmatprep.subr.mxu0 %v13525_v51  ;;  %v11817_v14 = vld [vmem:[%s13514_s2 + $0x38] sm:$0xf]  ;;  %v11820_v34 = vld [vmem:[%s13516_s3 + $0x4] sm:$0xf] }
 0x1b7   :  { %v12852_v1 = vpop.eup %11777  ;;  %11791 = vtanh.f32 %v5458_v57  ;;  %v5527_v31 = vpop.f32.mrf.mxu1  ;;  %11504 = vmatmul.mubr.msk.f32.vlgmr.msra.gmra.mxu1 %vm113_vm2, %v12194_v3  ;;  %v11818_v57 = vld [vmem:[%s13514_s2 + $0x3c] sm:$0xf] }
 0x1b8   :  { %v5597_v58 = vpop.f32.mrf.mxu0  ;;  %v12856_v37 = vpop.eup %11779  ;;  %v5528_v39 = vadd.f32 %v5527_v31, %v12816_v35  ;;  %11509 = vmatmul.mubr.msk.f32.vlgmr.msra.gmra.mxu0 %vm113_vm2, %v12205_v6  ;;  %11512 = vmatpush3.xpose.msk.msra.mxu1 %vm113_vm2, %v12852_v1 }
 0x1b9   :  { %v5598_v27 = vadd.f32 %v5597_v58, %v12818_v19  ;;  %11517 = vmatpush3.xpose.msk.msra.mxu0 %vm113_vm2, %v12856_v37  ;;  %v11395_v41 = vpop.f32.mrf.mxu1  ;;  %11513 = vmatprep.mubr.msk.f32.mxu1 %vm11836_vm0, %v13525_v51 }
 0x1ba   :  { %v11400_v52 = vpop.f32.mrf.mxu0  ;;  %11793 = vtanh.f32 %v5528_v39  ;;  %11518 = vmatprep.mubr.msk.f32.mxu0 %vm11836_vm0, %v13525_v51  ;;  %11521 = vmatprep.subr.mxu1 %v13525_v51 }
 0x1bb   :  { %v12871_v3 = vpop.eup %11781  ;;  %11795 = vtanh.f32 %v5598_v27  ;;  %v5667_v6 = vpop.f32.mrf.mxu1  ;;  %11514 = vmatmul.mubr.msk.f32.vlgmr.msra.gmra.mxu1 %vm113_vm2, %v12222_v7  ;;  %11526 = vmatprep.subr.mxu0 %v13525_v51 }
 0x1bc   :  { %v5737_v35 = vpop.f32.mrf.mxu0  ;;  %v12876_v19 = vpop.eup %11783  ;;  %v5668_v62 = vadd.f32 %v5667_v6, %v12820_v47  ;;  %11519 = vmatmul.mubr.msk.f32.vlgmr.msra.gmra.mxu0 %vm113_vm2, %v12233_v12  ;;  %11522 = vmatpush3.xpose.msk.msra.mxu1 %vm113_vm2, %v12871_v3 }
 0x1bd   :  { %v5738_v45 = vadd.f32 %v5737_v35, %v12822_v44  ;;  %11527 = vmatpush3.xpose.msk.msra.mxu0 %vm113_vm2, %v12876_v19  ;;  %v11405_v36 = vpop.f32.mrf.mxu1  ;;  %11523 = vmatprep.mubr.msk.f32.mxu1 %vm11836_vm0, %v13525_v51 }
 0x1be   :  { %v11410_v55 = vpop.f32.mrf.mxu0  ;;  %11797 = vtanh.f32 %v5668_v62  ;;  %11528 = vmatprep.mubr.msk.f32.mxu0 %vm11836_vm0, %v13525_v51  ;;  %11531 = vmatprep.subr.mxu1 %v13525_v51 }
 0x1bf   :  { %v12891_v7 = vpop.eup %11785  ;;  %11799 = vtanh.f32 %v5738_v45  ;;  %v5807_v12 = vpop.f32.mrf.mxu1  ;;  %11524 = vmatmul.mubr.msk.f32.vlgmr.msra.gmra.mxu1 %vm113_vm2, %v12250_v13  ;;  %11536 = vmatprep.subr.mxu0 %v13525_v51 }
 0x1c0   :  { %v12896_v47 = vpop.eup %11787  ;;  %v5808_v44 = vadd.f32 %v5807_v12, %v12824_v43  ;;  %11529 = vmatmul.mubr.msk.f32.vlgmr.msra.gmra.mxu0 %vm113_vm2, %v12261_v16  ;;  %11532 = vmatpush3.xpose.msk.msra.mxu1 %vm113_vm2, %v12891_v7  ;;  %v11805_v43 = vld [vmem:[%s13514_s2 + $0x8] sm:$0xf] }
 0x1c1   :  { %11537 = vmatpush3.xpose.msk.msra.mxu0 %vm113_vm2, %v12896_v47  ;;  %v11415_v63 = vpop.f32.mrf.mxu1  ;;  %11533 = vmatprep.mubr.msk.f32.mxu1 %vm11836_vm0, %v13525_v51 }
 0x1c2   :  { %11801 = vtanh.f32 %v5808_v44  ;;  %11538 = vmatprep.mubr.msk.f32.mxu0 %vm11836_vm0, %v13525_v51  ;;  %11541 = vmatprep.subr.mxu1 %v13525_v51 }
 0x1c3   :  { %v12910_v13 = vpop.eup %11789  ;;  %11534 = vmatmul.mubr.msk.f32.vlgmr.msra.gmra.mxu1 %vm113_vm2, %v12278_v17  ;;  %11546 = vmatprep.subr.mxu0 %v13525_v51 }
 0x1c4   :  { %v12915_v16 = vpop.eup %11791  ;;  %11539 = vmatmul.mubr.msk.f32.vlgmr.msra.gmra.mxu0 %vm113_vm2, %v12289_v20  ;;  %11542 = vmatpush3.xpose.msk.msra.mxu1 %vm113_vm2, %v12910_v13 }
 0x1c5   :  { %11547 = vmatpush3.xpose.msk.msra.mxu0 %vm113_vm2, %v12915_v16  ;;  %11543 = vmatprep.mubr.msk.f32.mxu1 %vm11836_vm0, %v13525_v51 }
 0x1c6   :  { %11548 = vmatprep.mubr.msk.f32.mxu0 %vm11836_vm0, %v13525_v51  ;;  %11551 = vmatprep.subr.mxu1 %v13525_v51 }
 0x1c7   :  { %v12928_v17 = vpop.eup %11793  ;;  %11544 = vmatmul.mubr.msk.f32.vlgmr.msra.gmra.mxu1 %vm113_vm2, %v12306_v21  ;;  %11556 = vmatprep.subr.mxu0 %v13525_v51 }
 0x1c8   :  { %v12933_v20 = vpop.eup %11795  ;;  %11549 = vmatmul.mubr.msk.f32.vlgmr.msra.gmra.mxu0 %vm113_vm2, %v12317_v24  ;;  %11552 = vmatpush3.xpose.msk.msra.mxu1 %vm113_vm2, %v12928_v17 }
 0x1c9   :  { %11557 = vmatpush3.xpose.msk.msra.mxu0 %vm113_vm2, %v12933_v20  ;;  %11553 = vmatprep.mubr.msk.f32.mxu1 %vm11836_vm0, %v13525_v51 }
 0x1ca   :  { %11558 = vmatprep.mubr.msk.f32.mxu0 %vm11836_vm0, %v13525_v51  ;;  %11561 = vmatprep.subr.mxu1 %v13525_v51 }
 0x1cb   :  { %v12946_v21 = vpop.eup %11797  ;;  %11554 = vmatmul.mubr.msk.f32.vlgmr.msra.gmra.mxu1 %vm113_vm2, %v12334_v25  ;;  %11566 = vmatprep.subr.mxu0 %v13525_v51 }
 0x1cc   :  { %v12951_v24 = vpop.eup %11799  ;;  %11559 = vmatmul.mubr.msk.f32.vlgmr.msra.gmra.mxu0 %vm113_vm2, %v12345_v28  ;;  %11562 = vmatpush3.xpose.msk.msra.mxu1 %vm113_vm2, %v12946_v21  ;;  %v13526_v28 = vld [vmem:[#allocation3_spill] sm:$0xff] }
 0x1cd   :  { %11567 = vmatpush3.xpose.msk.msra.mxu0 %vm113_vm2, %v12951_v24  ;;  %11563 = vmatprep.mubr.msk.f32.mxu1 %vm11836_vm0, %v13525_v51 }
 0x1ce   :  { %11568 = vmatprep.mubr.msk.f32.mxu0 %vm11836_vm0, %v13525_v51  ;;  %11571 = vmatprep.subr.mxu1 %v13525_v51 }
 0x1cf   :  { %v12964_v25 = vpop.eup %11801  ;;  %11564 = vmatmul.mubr.msk.f32.vlgmr.msra.gmra.mxu1 %vm113_vm2, %v12362_v29  ;;  %11576 = vmatprep.subr.mxu0 %v13525_v51  ;;  %v11803_v29 = vld [vmem:[%s13514_s2] sm:$0xf] }
 0x1d0   :  { %11569 = vmatmul.mubr.msk.f32.vlgmr.msra.gmra.mxu0 %vm113_vm2, %v12373_v32  ;;  %11572 = vmatpush3.xpose.msk.msra.mxu1 %vm113_vm2, %v12964_v25  ;;  %v11804_v32 = vld [vmem:[%s13514_s2 + $0x4] sm:$0xf] }
 0x1d1   :  { %11577 = vmatpush3.xpose.msk.msra.mxu0 %vm113_vm2, %v12833_v2  ;;  %11573 = vmatprep.mubr.msk.f32.mxu1 %vm11836_vm0, %v13525_v51  ;;  %v11806_v2 = vld [vmem:[%s13514_s2 + $0xc] sm:$0xf] }
 0x1d2   :  { %11578 = vmatprep.mubr.msk.f32.mxu0 %vm11836_vm0, %v13525_v51  ;;  %11581 = vmatprep.subr.mxu1 %v13525_v51 }
 0x1d3   :  { %11574 = vmatmul.mubr.msk.f32.vlgmr.msra.gmra.mxu1 %vm113_vm2, %v13526_v28  ;;  %11586 = vmatprep.subr.mxu0 %v13525_v51 }
 0x1d4   :  { %11579 = vmatmul.mubr.msk.f32.vlgmr.msra.gmra.mxu0 %vm113_vm2, %v11803_v29  ;;  %11582 = vmatpush3.xpose.msk.msra.mxu1 %vm113_vm2, %v12838_v4  ;;  %v11813_v4 = vld [vmem:[%s13514_s2 + $0x28] sm:$0xf] }
 0x1d5   :  { %11587 = vmatpush3.xpose.msk.msra.mxu0 %vm113_vm2, %v12842_v26  ;;  %11583 = vmatprep.mubr.msk.f32.mxu1 %vm11836_vm0, %v13525_v51  ;;  %v11816_v26 = vld [vmem:[%s13514_s2 + $0x34] sm:$0xf] }
 0x1d6   :  { %11588 = vmatprep.mubr.msk.f32.mxu0 %vm11836_vm0, %v13525_v51  ;;  %11591 = vmatprep.subr.mxu1 %v13525_v51 }
 0x1d7   :  { %11584 = vmatmul.mubr.msk.f32.vlgmr.msra.gmra.mxu1 %vm113_vm2, %v11804_v32  ;;  %11596 = vmatprep.subr.mxu0 %v13525_v51 }
 0x1d8   :  { %11589 = vmatmul.mubr.msk.f32.vlgmr.msra.gmra.mxu0 %vm113_vm2, %v11805_v43  ;;  %11592 = vmatpush3.xpose.msk.msra.mxu1 %vm113_vm2, %v12852_v1 }
 0x1d9   :  { %11597 = vmatpush3.xpose.msk.msra.mxu0 %vm113_vm2, %v12856_v37  ;;  %11593 = vmatprep.mubr.msk.f32.mxu1 %vm11836_vm0, %v13525_v51 }
 0x1da   :  { %11598 = vmatprep.mubr.msk.f32.mxu0 %vm11836_vm0, %v13525_v51  ;;  %11601 = vmatprep.subr.mxu1 %v13525_v51 }
 0x1db   :  { %11594 = vmatmul.mubr.msk.f32.vlgmr.msra.gmra.mxu1 %vm113_vm2, %v11806_v2  ;;  %11606 = vmatprep.subr.mxu0 %v13525_v51 }
 0x1dc   :  { %11599 = vmatmul.mubr.msk.f32.vlgmr.msra.gmra.mxu0 %vm113_vm2, %v11807_v59  ;;  %11602 = vmatpush3.xpose.msk.msra.mxu1 %vm113_vm2, %v12871_v3 }
 0x1dd   :  { %11607 = vmatpush3.xpose.msk.msra.mxu0 %vm113_vm2, %v12876_v19  ;;  %11603 = vmatprep.mubr.msk.f32.mxu1 %vm11836_vm0, %v13525_v51 }
 0x1de   :  { %11608 = vmatprep.mubr.msk.f32.mxu0 %vm11836_vm0, %v13525_v51  ;;  %11611 = vmatprep.subr.mxu1 %v13525_v51 }
 0x1df   :  { %11604 = vmatmul.mubr.msk.f32.vlgmr.msra.gmra.mxu1 %vm113_vm2, %v11808_v48  ;;  %11616 = vmatprep.subr.mxu0 %v13525_v51 }
 0x1e0   :  { %11609 = vmatmul.mubr.msk.f32.vlgmr.msra.gmra.mxu0 %vm113_vm2, %v11809_v0  ;;  %11612 = vmatpush3.xpose.msk.msra.mxu1 %vm113_vm2, %v12891_v7 }
 0x1e1   :  { %11617 = vmatpush3.xpose.msk.msra.mxu0 %vm113_vm2, %v12896_v47  ;;  %11613 = vmatprep.mubr.msk.f32.mxu1 %vm11836_vm0, %v13525_v51 }
 0x1e2   :  { %11618 = vmatprep.mubr.msk.f32.mxu0 %vm11836_vm0, %v13525_v51  ;;  %11621 = vmatprep.subr.mxu1 %v13525_v51 }
 0x1e3   :  { %11614 = vmatmul.mubr.msk.f32.vlgmr.msra.gmra.mxu1 %vm113_vm2, %v11810_v49  ;;  %11626 = vmatprep.subr.mxu0 %v13525_v51 }
 0x1e4   :  { %11619 = vmatmul.mubr.msk.f32.vlgmr.msra.gmra.mxu0 %vm113_vm2, %v11811_v15  ;;  %11622 = vmatpush3.xpose.msk.msra.mxu1 %vm113_vm2, %v12910_v13 }
 0x1e5   :  { %11627 = vmatpush3.xpose.msk.msra.mxu0 %vm113_vm2, %v12915_v16  ;;  %11623 = vmatprep.mubr.msk.f32.mxu1 %vm11836_vm0, %v13525_v51 }
 0x1e6   :  { %11628 = vmatprep.mubr.msk.f32.mxu0 %vm11836_vm0, %v13525_v51  ;;  %11631 = vmatprep.subr.mxu1 %v13525_v51 }
 0x1e7   :  { %11624 = vmatmul.mubr.msk.f32.vlgmr.msra.gmra.mxu1 %vm113_vm2, %v11812_v11  ;;  %11636 = vmatprep.subr.mxu0 %v13525_v51 }
 0x1e8   :  { %11629 = vmatmul.mubr.msk.f32.vlgmr.msra.gmra.mxu0 %vm113_vm2, %v11813_v4  ;;  %11632 = vmatpush3.xpose.msk.msra.mxu1 %vm113_vm2, %v12928_v17 }
 0x1e9   :  { %11637 = vmatpush3.xpose.msk.msra.mxu0 %vm113_vm2, %v12933_v20  ;;  %11633 = vmatprep.mubr.msk.f32.mxu1 %vm11836_vm0, %v13525_v51 }
 0x1ea   :  { %11638 = vmatprep.mubr.msk.f32.mxu0 %vm11836_vm0, %v13525_v51  ;;  %11641 = vmatprep.subr.mxu1 %v13525_v51 }
 0x1eb   :  { %11634 = vmatmul.mubr.msk.f32.vlgmr.msra.gmra.mxu1 %vm113_vm2, %v11814_v53  ;;  %11646 = vmatprep.subr.mxu0 %v13525_v51 }
 0x1ec   :  { %11639 = vmatmul.mubr.msk.f32.vlgmr.msra.gmra.mxu0 %vm113_vm2, %v11815_v23  ;;  %11642 = vmatpush3.xpose.msk.msra.mxu1 %vm113_vm2, %v12946_v21 }
 0x1ed   :  { %11647 = vmatpush3.xpose.msk.msra.mxu0 %vm113_vm2, %v12951_v24  ;;  %11643 = vmatprep.mubr.msk.f32.mxu1 %vm11836_vm0, %v13525_v51 }
 0x1ee   :  { %11648 = vmatprep.mubr.msk.f32.mxu0 %vm11836_vm0, %v13525_v51  ;;  %11651 = vmatprep.subr.mxu1 %v13525_v51 }
 0x1ef   :  { %11644 = vmatmul.mubr.msk.f32.vlgmr.msra.gmra.mxu1 %vm113_vm2, %v11816_v26  ;;  %11656 = vmatprep.subr.mxu0 %v13525_v51 }
 0x1f0   :  { %11649 = vmatmul.mubr.msk.f32.vlgmr.msra.gmra.mxu0 %vm113_vm2, %v11817_v14  ;;  %11652 = vmatpush3.xpose.msk.msra.mxu1 %vm113_vm2, %v12964_v25 }
 0x1f1   :  { %11657 = vmatpush3.xpose.msk.msra.mxu0 %vm113_vm2, %v12651_v40  ;;  %11653 = vmatprep.mubr.msk.f32.mxu1 %vm11836_vm0, %v13525_v51  ;;  %v11819_v40 = vld [vmem:[%s13516_s3] sm:$0xf] }
 0x1f2   :  { %11658 = vmatprep.mubr.msk.f32.mxu0 %vm11836_vm0, %v13525_v51  ;;  %11661 = vmatprep.subr.mxu1 %v13525_v51 }
 0x1f3   :  { %11654 = vmatmul.mubr.msk.f32.vlgmr.msra.gmra.mxu1 %vm113_vm2, %v11818_v57  ;;  %11666 = vmatprep.subr.mxu0 %v13525_v51 }
 0x1f4   :  { %11659 = vmatmul.mubr.msk.f32.vlgmr.msra.gmra.mxu0 %vm113_vm2, %v11819_v40  ;;  %11662 = vmatpush3.xpose.msk.msra.mxu1 %vm113_vm2, %v12656_v56  ;;  %v11821_v56 = vld [vmem:[%s13516_s3 + $0x8] sm:$0xf] }
 0x1f5   :  { %11667 = vmatpush3.xpose.msk.msra.mxu0 %vm113_vm2, %v12660_v5  ;;  %11663 = vmatprep.mubr.msk.f32.mxu1 %vm11836_vm0, %v13525_v51  ;;  %v11822_v5 = vld [vmem:[%s13516_s3 + $0xc] sm:$0xf] }
 0x1f6   :  { %11668 = vmatprep.mubr.msk.f32.mxu0 %vm11836_vm0, %v13525_v51  ;;  %11671 = vmatprep.subr.mxu1 %v13525_v51 }
 0x1f7   :  { %11664 = vmatmul.mubr.msk.f32.vlgmr.msra.gmra.mxu1 %vm113_vm2, %v11820_v34  ;;  %11676 = vmatprep.subr.mxu0 %v13525_v51 }
 0x1f8   :  { %11669 = vmatmul.mubr.msk.f32.vlgmr.msra.gmra.mxu0 %vm113_vm2, %v11821_v56  ;;  %11672 = vmatpush3.xpose.msk.msra.mxu1 %vm113_vm2, %v12672_v9  ;;  %v11823_v9 = vld [vmem:[%s13516_s3 + $0x10] sm:$0xf] }
 0x1f9   :  { %11677 = vmatpush3.xpose.msk.msra.mxu0 %vm113_vm2, %v12676_v18  ;;  %11673 = vmatprep.mubr.msk.f32.mxu1 %vm11836_vm0, %v13525_v51  ;;  %v11824_v18 = vld [vmem:[%s13516_s3 + $0x14] sm:$0xf] }
 0x1fa   :  { %11678 = vmatprep.mubr.msk.f32.mxu0 %vm11836_vm0, %v13525_v51  ;;  %11681 = vmatprep.subr.mxu1 %v13525_v51 }
 0x1fb   :  { %11674 = vmatmul.mubr.msk.f32.vlgmr.msra.gmra.mxu1 %vm113_vm2, %v11822_v5  ;;  %11686 = vmatprep.subr.mxu0 %v13525_v51 }
 0x1fc   :  { %11679 = vmatmul.mubr.msk.f32.vlgmr.msra.gmra.mxu0 %vm113_vm2, %v11823_v9  ;;  %11682 = vmatpush3.xpose.msk.msra.mxu1 %vm113_vm2, %v12691_v10  ;;  %v11825_v10 = vld [vmem:[%s13516_s3 + $0x18] sm:$0xf] }
 0x1fd   :  { %11687 = vmatpush3.xpose.msk.msra.mxu0 %vm113_vm2, %v12696_v22  ;;  %11683 = vmatprep.mubr.msk.f32.mxu1 %vm11836_vm0, %v13525_v51  ;;  %v11826_v22 = vld [vmem:[%s13516_s3 + $0x1c] sm:$0xf] }
 0x1fe   :  { %11688 = vmatprep.mubr.msk.f32.mxu0 %vm11836_vm0, %v13525_v51  ;;  %11691 = vmatprep.subr.mxu1 %v13525_v51 }
 0x1ff   :  { %11684 = vmatmul.mubr.msk.f32.vlgmr.msra.gmra.mxu1 %vm113_vm2, %v11824_v18  ;;  %11696 = vmatprep.subr.mxu0 %v13525_v51 }
 0x200   :  { %11689 = vmatmul.mubr.msk.f32.vlgmr.msra.gmra.mxu0 %vm113_vm2, %v11825_v10  ;;  %11692 = vmatpush3.xpose.msk.msra.mxu1 %vm113_vm2, %v12711_v38  ;;  %v11827_v38 = vld [vmem:[%s13516_s3 + $0x20] sm:$0xf] }
 0x201   :  { %11697 = vmatpush3.xpose.msk.msra.mxu0 %vm113_vm2, %v12718_v30  ;;  %11693 = vmatprep.mubr.msk.f32.mxu1 %vm11836_vm0, %v13525_v51  ;;  %v11828_v30 = vld [vmem:[%s13516_s3 + $0x24] sm:$0xf] }
 0x202   :  { %11698 = vmatprep.mubr.msk.f32.mxu0 %vm11836_vm0, %v13525_v51  ;;  %11701 = vmatprep.subr.mxu1 %v13525_v51 }
 0x203   :  { %11694 = vmatmul.mubr.msk.f32.vlgmr.msra.gmra.mxu1 %vm113_vm2, %v11826_v22  ;;  %11706 = vmatprep.subr.mxu0 %v13525_v51 }
 0x204   :  { %11699 = vmatmul.mubr.msk.f32.vlgmr.msra.gmra.mxu0 %vm113_vm2, %v11827_v38  ;;  %11702 = vmatpush3.xpose.msk.msra.mxu1 %vm113_vm2, %v12732_v42  ;;  %v11829_v42 = vld [vmem:[%s13516_s3 + $0x28] sm:$0xf] }
 0x205   :  { %11707 = vmatpush3.xpose.msk.msra.mxu0 %vm113_vm2, %v12741_v60  ;;  %11703 = vmatprep.mubr.msk.f32.mxu1 %vm11836_vm0, %v13525_v51  ;;  %v11830_v60 = vld [vmem:[%s13516_s3 + $0x2c] sm:$0xf] }
 0x206   :  { %11708 = vmatprep.mubr.msk.f32.mxu0 %vm11836_vm0, %v13525_v51  ;;  %11711 = vmatprep.subr.mxu1 %v13525_v51 }
 0x207   :  { %11704 = vmatmul.mubr.msk.f32.vlgmr.msra.gmra.mxu1 %vm113_vm2, %v11828_v30  ;;  %11716 = vmatprep.subr.mxu0 %v13525_v51 }
 0x208   :  { %11709 = vmatmul.mubr.msk.f32.vlgmr.msra.gmra.mxu0 %vm113_vm2, %v11829_v42  ;;  %11712 = vmatpush3.xpose.msk.msra.mxu1 %vm113_vm2, %v12754_v46  ;;  %v11831_v46 = vld [vmem:[%s13516_s3 + $0x30] sm:$0xf] }
 0x209   :  { %11717 = vmatpush3.xpose.msk.msra.mxu0 %vm113_vm2, %v12763_v33  ;;  %11713 = vmatprep.mubr.msk.f32.mxu1 %vm11836_vm0, %v13525_v51  ;;  %v11832_v33 = vld [vmem:[%s13516_s3 + $0x34] sm:$0xf] }
 0x20a   :  { %11718 = vmatprep.mubr.msk.f32.mxu0 %vm11836_vm0, %v13525_v51  ;;  %11721 = vmatprep.subr.mxu1 %v13525_v51 }
 0x20b   :  { %11714 = vmatmul.mubr.msk.f32.vlgmr.msra.gmra.mxu1 %vm113_vm2, %v11830_v60  ;;  %11726 = vmatprep.subr.mxu0 %v13525_v51 }
 0x20c   :  { %11719 = vmatmul.mubr.msk.f32.vlgmr.msra.gmra.mxu0 %vm113_vm2, %v11831_v46  ;;  %11722 = vmatpush3.xpose.msk.msra.mxu1 %vm113_vm2, %v12776_v50  ;;  %v11833_v50 = vld [vmem:[%s13516_s3 + $0x38] sm:$0xf] }
 0x20d   :  { %11727 = vmatpush3.xpose.msk.msra.mxu0 %vm113_vm2, %v12785_v8  ;;  %11723 = vmatprep.mubr.msk.f32.mxu1 %vm11836_vm0, %v13525_v51  ;;  %v11834_v8 = vld [vmem:[%s13516_s3 + $0x3c] sm:$0xf]  ;;  %s11837_s3 = smov 4  }
 0x20e   :  { %11728 = vmatprep.mubr.msk.f32.mxu0 %vm11836_vm0, %v13525_v51  ;;  %11731 = vmatprep.subr.mxu1 %v13525_v51 }
 0x20f   :  { %11724 = vmatmul.mubr.msk.f32.vlgmr.msra.gmra.mxu1 %vm113_vm2, %v11832_v33 }
 0x210   :  { %11729 = vmatmul.mubr.msk.f32.vlgmr.msra.gmra.mxu0 %vm113_vm2, %v11833_v50  ;;  %11732 = vmatpush3.xpose.msk.msra.mxu1 %vm113_vm2, %v12798_v54 }
 0x211   :  { %11733 = vmatprep.mubr.msk.f32.mxu1 %vm11836_vm0, %v13525_v51 }
 0x213   :  { %11734 = vmatmul.mubr.msk.f32.vlgmr.msra.gmra.mxu1 %vm113_vm2, %v11834_v8 }
 0x233   :  { %v13264_v61 = vpop.f32.mrf.mxu0 }
 0x235   :  { %v11420_v1 = vpop.f32.mrf.mxu0 }
 0x237   :  { %v13266_v31 = vpop.f32.mrf.mxu1 }
 0x238   :  { %v13268_v58 = vpop.f32.mrf.mxu0 }
 0x239   :  { %v11425_v37 = vpop.f32.mrf.mxu1 }
 0x23a   :  { %v11430_v39 = vpop.f32.mrf.mxu0 }
 0x23b   :  { %v13270_v27 = vpop.f32.mrf.mxu1 }
 0x23c   :  { %v13272_v54 = vpop.f32.mrf.mxu0 }
 0x23d   :  { %v11435_v51 = vpop.f32.mrf.mxu1 }
 0x23e   :  { %v11440_v41 = vpop.f32.mrf.mxu0 }
 0x23f   :  { %v13274_v52 = vpop.f32.mrf.mxu1 }
 0x240   :  { %v13276_v3 = vpop.f32.mrf.mxu0 }
 0x241   :  { %v11445_v6 = vpop.f32.mrf.mxu1 }
 0x242   :  { %v11450_v35 = vpop.f32.mrf.mxu0 }
 0x243   :  { %v13278_v19 = vpop.f32.mrf.mxu1 }
 0x244   :  { %v13280_v62 = vpop.f32.mrf.mxu0 }
 0x245   :  { %v11455_v45 = vpop.f32.mrf.mxu1 }
 0x246   :  { %v11460_v36 = vpop.f32.mrf.mxu0 }
 0x247   :  { %v13282_v55 = vpop.f32.mrf.mxu1 }
 0x248   :  { %v13284_v7 = vpop.f32.mrf.mxu0 }
 0x249   :  { %v11465_v12 = vpop.f32.mrf.mxu1 }
 0x24a   :  { %v11470_v47 = vpop.f32.mrf.mxu0 }
 0x24b   :  { %v13286_v44 = vpop.f32.mrf.mxu1 }
 0x24c   :  { %v13288_v63 = vpop.f32.mrf.mxu0 }
 0x24d   :  { %v11475_v13 = vpop.f32.mrf.mxu1 }
 0x24e   :  { %v11480_v16 = vpop.f32.mrf.mxu0 }
 0x24f   :  { %v13290_v17 = vpop.f32.mrf.mxu1 }
 0x250   :  { %v13292_v20 = vpop.f32.mrf.mxu0 }
 0x251   :  { %v11485_v21 = vpop.f32.mrf.mxu1 }
 0x252   :  { %v11490_v24 = vpop.f32.mrf.mxu0 }
 0x253   :  { %v13294_v25 = vpop.f32.mrf.mxu1 }
 0x255   :  { %v11495_v28 = vpop.f32.mrf.mxu1 }
 0x274   :  { %v13296_v29 = vpop.f32.mrf.mxu0 }
 0x275   :  { %v8227_v32 = vsub.f32 %v13264_v61, %v13296_v29 }
 0x276   :  { %v11500_v43 = vpop.f32.mrf.mxu0 }
 0x277   :  { %v13300_v2 = vpop.f32.mrf.mxu1 }
 0x278   :  { %v13304_v48 = vpop.f32.mrf.mxu0 }
 0x279   :  { %v11505_v49 = vpop.f32.mrf.mxu1  ;;  %v13528_v61 = vsub.f32 %v13268_v58, %v13304_v48 }
 0x27a   :  { %v11510_v15 = vpop.f32.mrf.mxu0 }
 0x27b   :  { %v13308_v11 = vpop.f32.mrf.mxu1 }
 0x27c   :  { %v13312_v53 = vpop.f32.mrf.mxu0 }
 0x27d   :  { %v11515_v26 = vpop.f32.mrf.mxu1 }
 0x27e   :  { %v11520_v14 = vpop.f32.mrf.mxu0 }
 0x27f   :  { %v13316_v57 = vpop.f32.mrf.mxu1 }
 0x280   :  { %v13320_v34 = vpop.f32.mrf.mxu0 }
 0x281   :  { %v11525_v5 = vpop.f32.mrf.mxu1 }
 0x282   :  { %v11530_v9 = vpop.f32.mrf.mxu0 }
 0x283   :  { %v13324_v18 = vpop.f32.mrf.mxu1 }
 0x284   :  { %v13328_v22 = vpop.f32.mrf.mxu0 }
 0x285   :  { %v11535_v30 = vpop.f32.mrf.mxu1 }
 0x286   :  { %v11540_v42 = vpop.f32.mrf.mxu0 }
 0x287   :  { %v13332_v60 = vpop.f32.mrf.mxu1 }
 0x288   :  { %v13336_v33 = vpop.f32.mrf.mxu0 }
 0x289   :  { %v11545_v8 = vpop.f32.mrf.mxu1 }
 0x28a   :  { %v11550_v1 = vpop.f32.mrf.mxu0 }
 0x28b   :  { %v13340_v37 = vpop.f32.mrf.mxu1 }
 0x28c   :  { %v13344_v51 = vpop.f32.mrf.mxu0 }
 0x28d   :  { %v11555_v6 = vpop.f32.mrf.mxu1 }
 0x28e   :  { %v11560_v35 = vpop.f32.mrf.mxu0 }
 0x28f   :  { %v13348_v45 = vpop.f32.mrf.mxu1 }
 0x290   :  { %v13352_v12 = vpop.f32.mrf.mxu0 }
 0x291   :  { %v11565_v13 = vpop.f32.mrf.mxu1 }
 0x292   :  { %v11570_v16 = vpop.f32.mrf.mxu0 }
 0x293   :  { %v13356_v21 = vpop.f32.mrf.mxu1 }
 0x294   :  { %v8309_v28 = vpop.f32.mrf.mxu0 }
 0x295   :  { %v11575_v43 = vpop.f32.mrf.mxu1 }
 0x296   :  { %v11580_v49 = vpop.f32.mrf.mxu0 }
 0x297   :  { %v8379_v15 = vpop.f32.mrf.mxu1 }
 0x298   :  { %v8449_v26 = vpop.f32.mrf.mxu0 }
 0x299   :  { %v11585_v14 = vpop.f32.mrf.mxu1 }
 0x29a   :  { %v11590_v5 = vpop.f32.mrf.mxu0 }
 0x29b   :  { %v8519_v9 = vpop.f32.mrf.mxu1 }
 0x29c   :  { %v8589_v30 = vpop.f32.mrf.mxu0 }
 0x29d   :  { %v11595_v42 = vpop.f32.mrf.mxu1 }
 0x29e   :  { %v11600_v8 = vpop.f32.mrf.mxu0 }
 0x29f   :  { %v8659_v1 = vpop.f32.mrf.mxu1 }
 0x2a0   :  { %v8729_v6 = vpop.f32.mrf.mxu0 }
 0x2a1   :  { %v11605_v35 = vpop.f32.mrf.mxu1 }
 0x2a2   :  { %v11610_v13 = vpop.f32.mrf.mxu0 }
 0x2a3   :  { %v8799_v16 = vpop.f32.mrf.mxu1 }
 0x2a4   :  { %v8869_v47 = vpop.f32.mrf.mxu0 }
 0x2a5   :  { %v11615_v41 = vpop.f32.mrf.mxu1 }
 0x2a6   :  { %v11620_v50 = vpop.f32.mrf.mxu0 }
 0x2a7   :  { %v8939_v24 = vpop.f32.mrf.mxu1 }
 0x2a8   :  { %v13360_v36 = vpop.f32.mrf.mxu0 }
 0x2a9   :  { %v11625_v43 = vpop.f32.mrf.mxu1 }
 0x2aa   :  { %v11630_v49 = vpop.f32.mrf.mxu0 }
 0x2ab   :  { %v9079_v38 = vpop.f32.mrf.mxu1 }
 0x2ac   :  { %v13362_v14 = vpop.f32.mrf.mxu0 }
 0x2ad   :  { %v11635_v5 = vpop.f32.mrf.mxu1 }
 0x2ae   :  { %v11640_v39 = vpop.f32.mrf.mxu0 }
 0x2af   :  { %v9219_v42 = vpop.f32.mrf.mxu1 }
 0x2b0   :  { %v13364_v8 = vpop.f32.mrf.mxu0 }
 0x2b1   :  { %v11645_v56 = vpop.f32.mrf.mxu1 }
 0x2b2   :  { %v11650_v35 = vpop.f32.mrf.mxu0 }
 0x2b3   :  { %v9359_v13 = vpop.f32.mrf.mxu1 }
 0x2b4   :  { %v9429_v46 = vpop.f32.mrf.mxu0 }
 0x2b5   :  { %v9430_v23 = vadd.f32 %v9429_v46, %v8309_v28  ;;  %v11655_v41 = vpop.f32.mrf.mxu1 }
 0x2b6   :  { %v11660_v50 = vpop.f32.mrf.mxu0 }
 0x2b7   :  { %10499 = vrot.lane.b32.xlu0 %v9430_v23, %s11837_s3  ;;  %v9499_v43 = vpop.f32.mrf.mxu1 }
 0x2b8   :  { %v9500_v49 = vadd.f32 %v9499_v43, %v8379_v15  ;;  %v9569_v10 = vpop.f32.mrf.mxu0 }
 0x2b9   :  { %v11665_v4 = vpop.f32.mrf.mxu1  ;;  %v9570_v5 = vadd.f32 %v9569_v10, %v8449_v26 }
 0x2ba   :  { %v11670_v40 = vpop.f32.mrf.mxu0  ;;  %10501 = vrot.lane.b32.xlu1 %v9500_v49, %s11837_s3 }
 0x2bb   :  { %v9639_v39 = vpop.f32.mrf.mxu1 }
 0x2bc   :  { %v9709_v0 = vpop.f32.mrf.mxu0  ;;  %v9640_v28 = vadd.f32 %v9639_v39, %v8519_v9 }
 0x2bd   :  { %v11675_v56 = vpop.f32.mrf.mxu1  ;;  %v9710_v40 = vadd.f32 %v9709_v0, %v8589_v30 }
 0x2be   :  { %v11680_v35 = vpop.f32.mrf.mxu0  ;;  %10503 = vrot.lane.b32.xlu1 %v9570_v5, %s11837_s3 }
 0x2bf   :  { %v9779_v46 = vpop.f32.mrf.mxu1 }
 0x2c0   :  { %v9780_v41 = vadd.f32 %v9779_v46, %v8659_v1  ;;  %v9849_v50 = vpop.f32.mrf.mxu0 }
 0x2c1   :  { %v11685_v59 = vpop.f32.mrf.mxu1  ;;  %v9850_v9 = vadd.f32 %v9849_v50, %v8729_v6 }
 0x2c2   :  { %v11690_v23 = vpop.f32.mrf.mxu0  ;;  %10509 = vrot.lane.b32.xlu0 %v9780_v41, %s11837_s3  ;;  %10505 = vrot.lane.b32.xlu1 %v9640_v28, %s11837_s3 }
 0x2c3   :  { %v9919_v4 = vpop.f32.mrf.mxu1 }
 0x2c4   :  { %v9920_v15 = vadd.f32 %v9919_v4, %v8799_v16  ;;  %v9989_v43 = vpop.f32.mrf.mxu0 }
 0x2c5   :  { %v11695_v10 = vpop.f32.mrf.mxu1  ;;  %v9990_v0 = vadd.f32 %v9989_v43, %v8869_v47 }
 0x2c6   :  { %v11700_v26 = vpop.f32.mrf.mxu0  ;;  %10513 = vrot.lane.b32.xlu0 %v9920_v15, %s11837_s3  ;;  %10507 = vrot.lane.b32.xlu1 %v9710_v40, %s11837_s3 }
 0x2c7   :  { %v10059_v49 = vpop.f32.mrf.mxu1  ;;  %v13530_v26 = vsub.f32 %v13270_v27, %v13308_v11  ;;  %v13532_v27 = vsub.f32 %v13272_v54, %v13312_v53  ;;  %v13534_v54 = vsub.f32 %v13276_v3, %v13320_v34  ;;  %v13536_v3 = vsub.f32 %v13280_v62, %v13328_v22 }
 0x2c8   :  { %v10060_v1 = vadd.f32 %v10059_v49, %v8939_v24  ;;  %v10129_v39 = vpop.f32.mrf.mxu0  ;;  %v13538_v62 = vsub.f32 %v13284_v7, %v13336_v33  ;;  %v13540_v7 = vsub.f32 %v13288_v63, %v13344_v51 }
 0x2c9   :  { %v11705_v59 = vpop.f32.mrf.mxu1  ;;  %v10130_v24 = vadd.f32 %v10129_v39, %v13360_v36 }
 0x2ca   :  { %v11710_v5 = vpop.f32.mrf.mxu0  ;;  %10517 = vrot.lane.b32.xlu0 %v10060_v1, %s11837_s3  ;;  %10511 = vrot.lane.b32.xlu1 %v9850_v9, %s11837_s3 }
 0x2cb   :  { %v10199_v56 = vpop.f32.mrf.mxu1 }
 0x2cc   :  { %v10200_v30 = vadd.f32 %v10199_v56, %v9079_v38  ;;  %v10269_v16 = vpop.f32.mrf.mxu0 }
 0x2cd   :  { %v11715_v35 = vpop.f32.mrf.mxu1  ;;  %v10270_v38 = vadd.f32 %v10269_v16, %v13362_v14 }
 0x2ce   :  { %v11720_v46 = vpop.f32.mrf.mxu0  ;;  %10521 = vrot.lane.b32.xlu0 %v10200_v30, %s11837_s3  ;;  %10515 = vrot.lane.b32.xlu1 %v9990_v0, %s11837_s3 }
 0x2cf   :  { %v10339_v28 = vpop.f32.mrf.mxu1 }
 0x2d0   :  { %v10340_v6 = vadd.f32 %v10339_v28, %v9219_v42  ;;  %v10409_v41 = vpop.f32.mrf.mxu0 }
 0x2d1   :  { %v11725_v50 = vpop.f32.mrf.mxu1  ;;  %v10410_v15 = vadd.f32 %v10409_v41, %v13364_v8 }
 0x2d2   :  { %10525 = vrot.lane.b32.xlu0 %v10340_v6, %s11837_s3  ;;  %10519 = vrot.lane.b32.xlu1 %v10130_v24, %s11837_s3  ;;  %v11730_v23 = vpop.f32.mrf.mxu0 }
 0x2d3   :  { %v10479_v47 = vpop.f32.mrf.mxu1 }
 0x2d4   :  { %v10480_v4 = vadd.f32 %v10479_v47, %v9359_v13  ;;  %v13527_v13 = vsub.f32 %v13266_v31, %v13300_v2  ;;  %v13529_v2 = vsub.f32 %v13274_v52, %v13316_v57  ;;  %v13531_v52 = vsub.f32 %v13278_v19, %v13324_v18 }
 0x2d5   :  { %v11735_v40 = vpop.f32.mrf.mxu1  ;;  %v13533_v19 = vsub.f32 %v13282_v55, %v13332_v60  ;;  %v13535_v55 = vsub.f32 %v13286_v44, %v13340_v37  ;;  %v13537_v44 = vsub.f32 %v13290_v17, %v13348_v45  ;;  %v13539_v17 = vsub.f32 %v13294_v25, %v13356_v21 }
 0x2d6   :  { %10529 = vrot.lane.b32.xlu0 %v10480_v4, %s11837_s3  ;;  %10523 = vrot.lane.b32.xlu1 %v10270_v38, %s11837_s3  ;;  %v13541_v25 = vsub.f32 %v13292_v20, %v13352_v12 }
 0x2da   :  { %10527 = vrot.lane.b32.xlu1 %v10410_v15, %s11837_s3 }
 0x329   :  { %v10500_v36 = vpop.permute.xlu0 %10499 }
 0x32a   :  { %v10547_v42 = vsel %vm113_vm2, %v8227_v32, %v10500_v36 }
 0x32b   :  { %10564 = vst.msk [vmem:[%s13517_s4] sm:$0xf] %vm10563_vm3, %v10547_v42 }
 0x32c   :  { %v10502_v14 = vpop.permute.xlu1 %10501 }
 0x32d   :  { %v10548_v8 = vsel %vm113_vm2, %v13527_v13, %v10502_v14 }
 0x32e   :  { %10565 = vst.msk [vmem:[%s13517_s4 + $0x4] sm:$0xf] %vm10563_vm3, %v10548_v8 }
 0x330   :  { %v10504_v43 = vpop.permute.xlu1 %10503 }
 0x331   :  { %v10549_v29 = vsel %vm113_vm2, %v13528_v61, %v10504_v43 }
 0x332   :  { %10566 = vst.msk [vmem:[%s13517_s4 + $0x8] sm:$0xf] %vm10563_vm3, %v10549_v29 }
 0x334   :  { %v10510_v32 = vpop.permute.xlu0 %10509  ;;  %v10506_v31 = vpop.permute.xlu1 %10505 }
 0x335   :  { %v10552_v10 = vsel %vm113_vm2, %v13529_v2, %v10510_v32  ;;  %v10550_v49 = vsel %vm113_vm2, %v13530_v26, %v10506_v31 }
 0x336   :  { %10569 = vst.msk [vmem:[%s13517_s4 + $0x14] sm:$0xf] %vm10563_vm3, %v10552_v10  ;;  %10567 = vst.msk [vmem:[%s13517_s4 + $0xc] sm:$0xf] %vm10563_vm3, %v10550_v49 }
 0x338   :  { %v10514_v58 = vpop.permute.xlu0 %10513  ;;  %v10508_v48 = vpop.permute.xlu1 %10507 }
 0x339   :  { %v10554_v57 = vsel %vm113_vm2, %v13531_v52, %v10514_v58  ;;  %v10551_v11 = vsel %vm113_vm2, %v13532_v27, %v10508_v48 }
 0x33a   :  { %10571 = vst.msk [vmem:[%s13517_s4 + $0x1c] sm:$0xf] %vm10563_vm3, %v10554_v57  ;;  %10568 = vst.msk [vmem:[%s13517_s4 + $0x10] sm:$0xf] %vm10563_vm3, %v10551_v11 }
 0x33c   :  { %v10518_v9 = vpop.permute.xlu0 %10517  ;;  %v10512_v1 = vpop.permute.xlu1 %10511 }
 0x33d   :  { %v10556_v18 = vsel %vm113_vm2, %v13533_v19, %v10518_v9  ;;  %v10553_v53 = vsel %vm113_vm2, %v13534_v54, %v10512_v1 }
 0x33e   :  { %10573 = vst.msk [vmem:[%s13517_s4 + $0x24] sm:$0xf] %vm10563_vm3, %v10556_v18  ;;  %10570 = vst.msk [vmem:[%s13517_s4 + $0x18] sm:$0xf] %vm10563_vm3, %v10553_v53 }
 0x340   :  { %v10522_v39 = vpop.permute.xlu0 %10521  ;;  %v10516_v59 = vpop.permute.xlu1 %10515 }
 0x341   :  { %v10558_v60 = vsel %vm113_vm2, %v13535_v55, %v10522_v39  ;;  %v10555_v34 = vsel %vm113_vm2, %v13536_v3, %v10516_v59 }
 0x342   :  { %10575 = vst.msk [vmem:[%s13517_s4 + $0x2c] sm:$0xf] %vm10563_vm3, %v10558_v60  ;;  %10572 = vst.msk [vmem:[%s13517_s4 + $0x20] sm:$0xf] %vm10563_vm3, %v10555_v34 }
 0x344   :  { %v10526_v5 = vpop.permute.xlu0 %10525  ;;  %v10520_v56 = vpop.permute.xlu1 %10519 }
 0x345   :  { %v10560_v37 = vsel %vm113_vm2, %v13537_v44, %v10526_v5  ;;  %v10557_v22 = vsel %vm113_vm2, %v13538_v62, %v10520_v56 }
 0x346   :  { %10577 = vst.msk [vmem:[%s13517_s4 + $0x34] sm:$0xf] %vm10563_vm3, %v10560_v37  ;;  %10574 = vst.msk [vmem:[%s13517_s4 + $0x28] sm:$0xf] %vm10563_vm3, %v10557_v22 }
 0x348   :  { %v10530_v0 = vpop.permute.xlu0 %10529  ;;  %v10524_v30 = vpop.permute.xlu1 %10523 }
 0x349   :  { %v10562_v45 = vsel %vm113_vm2, %v13539_v17, %v10530_v0  ;;  %v10559_v33 = vsel %vm113_vm2, %v13540_v7, %v10524_v30 }
 0x34a   :  { %10579 = vst.msk [vmem:[%s13517_s4 + $0x3c] sm:$0xf] %vm10563_vm3, %v10562_v45  ;;  %10576 = vst.msk [vmem:[%s13517_s4 + $0x30] sm:$0xf] %vm10563_vm3, %v10559_v33 }
 0x34c   :  { %v10528_v16 = vpop.permute.xlu1 %10527 }
 0x34d   :  { %v10561_v21 = vsel %vm113_vm2, %v13541_v25, %v10528_v16 }
 0x34e   :  { %10578 = vst.msk [vmem:[%s13517_s4 + $0x38] sm:$0xf] %vm10563_vm3, %v10561_v21 }

</bundles_post_ra>
